<compile_context>
chip_gen: v6e
topology: v6e:2x2x1
jax: 0.10.0
libtpu: 0.0.40
codegen_flags: <defaults>
</compile_context>

<pallas_src>
import functools

import jax
import jax.numpy as jnp
from jax import lax
from jax.experimental import pallas as pl
from jax.experimental.pallas import tpu as pltpu


# ------------------------------- Pallas kernel -------------------------------

def _inverted_block_kernel(x_ref, w1c_ref, b1c_ref, wdw_ref, bdw_ref, mask_ref,
                           sel_ref, w3a_ref, b3_ref, o_ref, *, k, pad, W, cexp):
    # x_ref    : (Cin, L)            bf16   L  = G*H*W
    # w1c_ref  : (Cexp+Cout, Cin)    bf16   [expansion ; shortcut] weights
    # b1c_ref  : (Cexp+Cout, 1)      f32
    # wdw_ref  : (Cexp, k*k)         f32    depthwise weights, tap i = kh*k+kw
    # bdw_ref  : (Cexp, 1)           f32
    # mask_ref : (k*k, L)            f32    1.0 inside the image, 0.0 at borders
    # sel_ref  : (L, Lo)             bf16   block-diag 0/1 stride selector, Lo = G*Ho*Wo
    # w3a_ref  : (Cout, Cexp+Cout)   bf16   [w3 | I] augmented projection
    # b3_ref   : (Cout, 1)           f32
    # o_ref    : (Cout, Lo)          f32
    x = x_ref[...]                                             # (Cin, L) bf16

    # ---- merged 1x1 expansion + shortcut conv (+folded BN): one bf16 MXU GEMM ----
    u = jnp.dot(w1c_ref[...], x, preferred_element_type=jnp.float32) + b1c_ref[...]
    t = jnp.clip(u[:cexp], 0.0, 6.0)                           # (Cexp, L) ReLU6
    s = u[cexp:]                                               # (Cout, L) shortcut

    # ---- kxk depthwise conv at full resolution: XLU lane-rotations + VPU FMAs ----
    wdw = wdw_ref[...]                                         # (Cexp, k*k)
    masks = mask_ref[...]                                      # (k*k, L)
    L = t.shape[1]
    center = pad * k + pad                                     # tap with offset 0
    acc = t * wdw[:, center:center + 1]                        # init with center tap
    for kh in range(k):
        for kw in range(k):
            i = kh * k + kw
            if i == center:
                continue
            off = (kh - pad) * W + (kw - pad)
            tap = pltpu.roll(t, (-off) % L, axis=1) * masks[i:i + 1, :]
            acc = acc + tap * wdw[:, i:i + 1]
    acc = jnp.clip(acc + bdw_ref[...], 0.0, 6.0)               # (Cexp, L)

    # ---- spatial stride applied EARLY: bf16 0/1-selection GEMM on [acc ; shortcut] ----
    z = jnp.concatenate([acc, s], axis=0).astype(jnp.bfloat16)  # (Cexp+Cout, L)
    zs = jnp.dot(z, sel_ref[...], preferred_element_type=jnp.float32)  # (Cexp+Cout, Lo)

    # ---- augmented projection [w3 | I] (+folded BN): proj + shortcut in one GEMM ----
    y = jnp.dot(w3a_ref[...], zs.astype(jnp.bfloat16),
                preferred_element_type=jnp.float32) + b3_ref[...]       # (Cout, Lo)

    # ---- SiLU + lane-dense store ----
    o_ref[...] = y * jax.nn.sigmoid(y)


def inverted_block_pallas(x_nchw, params, *, k, stride, images_per_step=None):
    N, Cin, H, W = x_nchw.shape
    pad = (k - 1) // 2
    Ho = (H + 2 * pad - k) // stride + 1
    Wo = (W + 2 * pad - k) // stride + 1
    # convert-conv output size must match bottleneck output size (as in PyTorch)
    assert (H - 1) // stride + 1 == Ho and (W - 1) // stride + 1 == Wo
    w1c, b1c, wdw, bdw, w3a, b3 = params
    Cexp = wdw.shape[0]
    Cout = w3a.shape[0]
    HW, HoWo = H * W, Ho * Wo

    # images per grid step: pick the largest divisor of N whose output lane width
    # is a multiple of 128 (lane-dense stores); fall back to the whole batch.
    if images_per_step is None:
        G = N
        for g in range(N, 0, -1):
            if N % g == 0 and (g * HoWo) % 128 == 0:
                G = g
                break
    else:
        G = images_per_step
    assert N % G == 0
    L, Lo = G * HW, G * HoWo

    # channels-first, batch folded into the lane axis: (Cin, N*H*W)
    x_flat = jnp.transpose(x_nchw.reshape(N, Cin, HW), (1, 0, 2)).reshape(Cin, N * HW)
    x_flat = x_flat.astype(jnp.bfloat16)

    # per-group constant tables (flat 2-D, lane-major)
    masks = jnp.tile(build_tap_masks(H, W, k), (1, G))                     # (k*k, L) f32
    sel = jnp.kron(jnp.eye(G, dtype=jnp.float32),
                   build_stride_selector(H, W, stride, Ho, Wo)).astype(jnp.bfloat16)  # (L, Lo)

    kernel = functools.partial(_inverted_block_kernel, k=k, pad=pad, W=W, cexp=Cexp)

    out_flat = pl.pallas_call(
        kernel,
        out_shape=jax.ShapeDtypeStruct((Cout, N * HoWo), jnp.float32),
        grid_spec=pltpu.PrefetchScalarGridSpec(
            num_scalar_prefetch=0,
            grid=(N // G,),
            in_specs=[
                pl.BlockSpec((Cin, L), lambda n: (0, n)),                 # x
                pl.BlockSpec((Cexp + Cout, Cin), lambda n: (0, 0)),       # [w1; wc]
                pl.BlockSpec((Cexp + Cout, 1), lambda n: (0, 0)),         # [b1; bc]
                pl.BlockSpec((Cexp, k * k), lambda n: (0, 0)),            # depthwise w
                pl.BlockSpec((Cexp, 1), lambda n: (0, 0)),                # depthwise b
                pl.BlockSpec((k * k, L), lambda n: (0, 0)),               # tap masks
                pl.BlockSpec((L, Lo), lambda n: (0, 0)),                  # stride selector
                pl.BlockSpec((Cout, Cexp + Cout), lambda n: (0, 0)),      # [w3 | I]
                pl.BlockSpec((Cout, 1), lambda n: (0, 0)),                # b3
            ],
            out_specs=pl.BlockSpec((Cout, Lo), lambda n: (0, n)),
        ),
        compiler_params=pltpu.CompilerParams(dimension_semantics=("parallel",)),
    )(x_flat, w1c, b1c, wdw, bdw, masks, sel, w3a, b3)

    out = jnp.transpose(out_flat.reshape(Cout, N, HoWo), (1, 0, 2))
    return out.reshape(N, Cout, Ho, Wo)


# ------------------------ constant helper arrays (wrapper) -------------------

def build_tap_masks(H, W, k):
    """(k*k, H*W) f32 validity masks (per destination pixel) for each depthwise tap."""
    pad = (k - 1) // 2
    hh = jnp.arange(H)[:, None]
    ww = jnp.arange(W)[None, :]
    rows = []
    for kh in range(k):
        for kw in range(k):
            dh, dw = kh - pad, kw - pad
            ok = ((hh + dh >= 0) & (hh + dh < H) &
                  (ww + dw >= 0) & (ww + dw < W))
            rows.append(ok.astype(jnp.float32).reshape(1, H * W))
    return jnp.concatenate(rows, axis=0)


def build_stride_selector(H, W, stride, Ho, Wo):
    """(H*W, Ho*Wo) f32 0/1 matrix: y_sub = y_full @ sel applies the stride."""
    src = (jnp.arange(Ho) * stride)[:, None] * W + (jnp.arange(Wo) * stride)[None, :]
    sel = jax.nn.one_hot(src.reshape(-1), H * W, dtype=jnp.float32)  # (Ho*Wo, H*W)
    return jnp.transpose(sel, (1, 0))                                # (H*W, Ho*Wo)


# ----------------------------- parameter setup -------------------------------

def init_raw_params(key, in_ch, out_ch, k, expansion):
    cexp = in_ch * expansion
    ks = list(jax.random.split(key, 24))
    it = iter(ks)

    def u(shape, scale):
        return jax.random.uniform(next(it), shape, jnp.float32, -scale, scale)

    def bn(c):
        return (1.0 + 0.1 * jax.random.normal(next(it), (c,), jnp.float32),   # gamma
                0.1 * jax.random.normal(next(it), (c,), jnp.float32),          # beta
                0.1 * jax.random.normal(next(it), (c,), jnp.float32),          # running mean
                0.5 + jax.random.uniform(next(it), (c,), jnp.float32))         # running var

    p = {}
    p["w1"] = u((cexp, in_ch, 1, 1), 1.0 / (in_ch ** 0.5))
    p["b1"] = u((cexp,), 1.0 / (in_ch ** 0.5))
    p["bn1"] = bn(cexp)
    p["wd"] = u((cexp, 1, k, k), 1.0 / (k * k) ** 0.5)
    p["bd"] = u((cexp,), 1.0 / (k * k) ** 0.5)
    p["bn2"] = bn(cexp)
    p["w3"] = u((out_ch, cexp, 1, 1), 1.0 / (cexp ** 0.5))
    p["b3"] = u((out_ch,), 1.0 / (cexp ** 0.5))
    p["bn3"] = bn(out_ch)
    p["wc"] = u((out_ch, in_ch, 1, 1), 1.0 / (in_ch ** 0.5))
    p["bc"] = u((out_ch,), 1.0 / (in_ch ** 0.5))
    return p


def fold_and_layout(p, in_ch, out_ch, k, stride, eps=1e-5):
    """Fold eval-mode BN into conv weights; emit merged kernel-layout params."""
    def fold(w, b, bn_params):
        g, bt, m, v = bn_params
        s = g / jnp.sqrt(v + eps)
        return w * s[:, None, None, None], (b - m) * s + bt

    w1, b1 = fold(p["w1"], p["b1"], p["bn1"])
    wd, bd = fold(p["wd"], p["bd"], p["bn2"])
    w3, b3 = fold(p["w3"], p["b3"], p["bn3"])
    cexp = w1.shape[0]

    if stride > 1 or in_ch != out_ch:
        wc = p["wc"][:, :, 0, 0]
        bc = p["bc"]
    else:
        wc = jnp.eye(in_ch, dtype=jnp.float32)                  # identity shortcut
        bc = jnp.zeros((out_ch,), jnp.float32)

    # merged expansion + shortcut weights: ONE GEMM against x in the kernel
    w1c = jnp.concatenate([w1[:, :, 0, 0], wc], axis=0).astype(jnp.bfloat16)   # (Cexp+Cout, Cin)
    b1c = jnp.concatenate([b1, bc], axis=0).reshape(-1, 1)                     # (Cexp+Cout, 1)
    # depthwise weights flattened to (Cexp, k*k), tap i = kh*k+kw
    wdw = wd[:, 0, :, :].reshape(cexp, k * k)
    bdw = bd.reshape(-1, 1)
    # augmented projection [w3 | I] so the shortcut rides through the same GEMM
    w3a = jnp.concatenate([w3[:, :, 0, 0], jnp.eye(out_ch, dtype=jnp.float32)],
                          axis=1).astype(jnp.bfloat16)                          # (Cout, Cexp+Cout)
    return (w1c, b1c, wdw, bdw, w3a, b3.reshape(-1, 1))


# --------------------------- pure-JAX reference ------------------------------

def reference_nchw(x, p, in_ch, out_ch, k, stride, eps=1e-5):
    pad = (k - 1) // 2
    cexp = p["w1"].shape[0]

    def bn(x, bn_params):
        g, bt, m, v = bn_params
        return (g[None, :, None, None] * (x - m[None, :, None, None])
                / jnp.sqrt(v[None, :, None, None] + eps) + bt[None, :, None, None])

    def conv(x, w, b, s, padding, groups=1):
        y = lax.conv_general_dilated(
            x, w, (s, s), [(padding, padding), (padding, padding)],
            dimension_numbers=("NCHW", "OIHW", "NCHW"),
            feature_group_count=groups, precision=lax.Precision.HIGHEST)
        return y + b[None, :, None, None]

    t = jnp.clip(bn(conv(x, p["w1"], p["b1"], 1, 0), p["bn1"]), 0.0, 6.0)
    t = jnp.clip(bn(conv(t, p["wd"], p["bd"], stride, pad, groups=cexp), p["bn2"]), 0.0, 6.0)
    t = bn(conv(t, p["w3"], p["b3"], 1, 0), p["bn3"])
    if stride > 1 or in_ch != out_ch:
        sc = conv(x, p["wc"], p["bc"], stride, 0)
    else:
        sc = x
    y = t + sc
    return y * jax.nn.sigmoid(y)


# ---------------------------------- main --------------------------------------

if __name__ == "__main__":
    in_ch, out_ch, kernel_size, stride, expansion = 4, 8, 3, 2, 4
    N, H, W = 2, 16, 16

    key = jax.random.PRNGKey(0)
    kx, kp = jax.random.split(key)
    x_nchw = jax.random.normal(kx, (N, in_ch, H, W), jnp.float32)

    raw = init_raw_params(kp, in_ch, out_ch, kernel_size, expansion)
    kernel_params = fold_and_layout(raw, in_ch, out_ch, kernel_size, stride)

    out = inverted_block_pallas(x_nchw, kernel_params, k=kernel_size, stride=stride)
    out = jax.block_until_ready(out)

    ref = reference_nchw(x_nchw, raw, in_ch, out_ch, kernel_size, stride)
    assert out.shape == ref.shape, (out.shape, ref.shape)
    max_err = float(jnp.max(jnp.abs(out - ref)))
    if not bool(jnp.allclose(out, ref, atol=5e-2, rtol=5e-2)):
        raise AssertionError(f"Pallas output mismatch vs reference, max_err={max_err}")
    print("KERNEL_OK")
</pallas_src>

<mosaic_0001>
module attributes {stable_mosaic.version = 11 : i64} {
  func.func @_inverted_block_kernel(%arg0: i32, %arg1: memref<4x512xbf16, #tpu.memory_space<vmem>>, %arg2: memref<24x4xbf16, #tpu.memory_space<vmem>>, %arg3: memref<24x1xf32, #tpu.memory_space<vmem>>, %arg4: memref<16x9xf32, #tpu.memory_space<vmem>>, %arg5: memref<16x1xf32, #tpu.memory_space<vmem>>, %arg6: memref<9x512xf32, #tpu.memory_space<vmem>>, %arg7: memref<512x128xbf16, #tpu.memory_space<vmem>>, %arg8: memref<8x24xbf16, #tpu.memory_space<vmem>>, %arg9: memref<8x1xf32, #tpu.memory_space<vmem>>, %arg10: memref<8x128xf32, #tpu.memory_space<vmem>>) attributes {dimension_semantics = [#tpu.dimension_semantics<parallel>], iteration_bounds = array<i64: 1>, scalar_prefetch = 0 : i64, scratch_operands = 0 : i64, tpu.core_type = #tpu.core_type<tc>, window_params = [{transform_indices = @transform_0, window_bounds = array<i64: 4, 512>}, {pipeline_mode = #tpu.pipeline_mode<synchronous>, transform_indices = @transform_1, window_bounds = array<i64: 24, 4>}, {pipeline_mode = #tpu.pipeline_mode<synchronous>, transform_indices = @transform_2, window_bounds = array<i64: 24, 1>}, {pipeline_mode = #tpu.pipeline_mode<synchronous>, transform_indices = @transform_3, window_bounds = array<i64: 16, 9>}, {pipeline_mode = #tpu.pipeline_mode<synchronous>, transform_indices = @transform_4, window_bounds = array<i64: 16, 1>}, {pipeline_mode = #tpu.pipeline_mode<synchronous>, transform_indices = @transform_5, window_bounds = array<i64: 9, 512>}, {pipeline_mode = #tpu.pipeline_mode<synchronous>, transform_indices = @transform_6, window_bounds = array<i64: 512, 128>}, {pipeline_mode = #tpu.pipeline_mode<synchronous>, transform_indices = @transform_7, window_bounds = array<i64: 8, 24>}, {pipeline_mode = #tpu.pipeline_mode<synchronous>, transform_indices = @transform_8, window_bounds = array<i64: 8, 1>}, {transform_indices = @transform_9, window_bounds = array<i64: 8, 128>}]} {
    %c0 = arith.constant 0 : index
    %c0_0 = arith.constant 0 : index
    %0 = vector.load %arg1[%c0, %c0_0] : memref<4x512xbf16, #tpu.memory_space<vmem>>, vector<4x512xbf16>
    %c0_1 = arith.constant 0 : index
    %c0_2 = arith.constant 0 : index
    %1 = vector.load %arg2[%c0_1, %c0_2] : memref<24x4xbf16, #tpu.memory_space<vmem>>, vector<24x4xbf16>
    %cst = arith.constant dense<0.000000e+00> : vector<24x512xf32>
    %2 = tpu.matmul %1, %0, %cst {dimension_numbers = #tpu.dot_dimension_numbers<[1], [0], [0], [1], [0, 0, 1, 1], [], []>} : vector<24x4xbf16>, vector<4x512xbf16>, vector<24x512xf32> -> vector<24x512xf32>
    %c0_3 = arith.constant 0 : index
    %c0_4 = arith.constant 0 : index
    %3 = vector.load %arg3[%c0_3, %c0_4] : memref<24x1xf32, #tpu.memory_space<vmem>>, vector<24x1xf32>
    %4 = vector.broadcast %3 : vector<24x1xf32> to vector<24x512xf32>
    %5 = arith.addf %2, %4 : vector<24x512xf32>
    %6 = vector.extract_strided_slice %5 {offsets = [0, 0], sizes = [16, 512], strides = [1, 1]} : vector<24x512xf32> to vector<16x512xf32>
    %cst_5 = arith.constant 0.000000e+00 : f32
    %cst_6 = arith.constant 6.000000e+00 : f32
    %7 = vector.broadcast %cst_5 : f32 to vector<16x512xf32>
    %8 = arith.maximumf %7, %6 : vector<16x512xf32>
    %9 = vector.broadcast %cst_6 : f32 to vector<16x512xf32>
    %10 = arith.minimumf %9, %8 : vector<16x512xf32>
    %11 = vector.extract_strided_slice %5 {offsets = [16, 0], sizes = [8, 512], strides = [1, 1]} : vector<24x512xf32> to vector<8x512xf32>
    %c0_7 = arith.constant 0 : index
    %c0_8 = arith.constant 0 : index
    %12 = vector.load %arg4[%c0_7, %c0_8] : memref<16x9xf32, #tpu.memory_space<vmem>>, vector<16x9xf32>
    %c0_9 = arith.constant 0 : index
    %c0_10 = arith.constant 0 : index
    %13 = vector.load %arg6[%c0_9, %c0_10] : memref<9x512xf32, #tpu.memory_space<vmem>>, vector<9x512xf32>
    %14 = vector.extract_strided_slice %12 {offsets = [0, 4], sizes = [16, 1], strides = [1, 1]} : vector<16x9xf32> to vector<16x1xf32>
    %15 = vector.broadcast %14 : vector<16x1xf32> to vector<16x512xf32>
    %16 = arith.mulf %10, %15 : vector<16x512xf32>
    %c17_i32 = arith.constant 17 : i32
    %17 = tpu.dynamic_rotate %10 by %c17_i32 dim 1 : vector<16x512xf32>, i32 -> vector<16x512xf32>
    %18 = vector.extract_strided_slice %13 {offsets = [0, 0], sizes = [1, 512], strides = [1, 1]} : vector<9x512xf32> to vector<1x512xf32>
    %19 = vector.broadcast %18 : vector<1x512xf32> to vector<16x512xf32>
    %20 = arith.mulf %17, %19 : vector<16x512xf32>
    %21 = vector.extract_strided_slice %12 {offsets = [0, 0], sizes = [16, 1], strides = [1, 1]} : vector<16x9xf32> to vector<16x1xf32>
    %22 = vector.broadcast %21 : vector<16x1xf32> to vector<16x512xf32>
    %23 = arith.mulf %20, %22 : vector<16x512xf32>
    %24 = arith.addf %16, %23 : vector<16x512xf32>
    %c16_i32 = arith.constant 16 : i32
    %25 = tpu.dynamic_rotate %10 by %c16_i32 dim 1 : vector<16x512xf32>, i32 -> vector<16x512xf32>
    %26 = vector.extract_strided_slice %13 {offsets = [1, 0], sizes = [1, 512], strides = [1, 1]} : vector<9x512xf32> to vector<1x512xf32>
    %27 = vector.broadcast %26 : vector<1x512xf32> to vector<16x512xf32>
    %28 = arith.mulf %25, %27 : vector<16x512xf32>
    %29 = vector.extract_strided_slice %12 {offsets = [0, 1], sizes = [16, 1], strides = [1, 1]} : vector<16x9xf32> to vector<16x1xf32>
    %30 = vector.broadcast %29 : vector<16x1xf32> to vector<16x512xf32>
    %31 = arith.mulf %28, %30 : vector<16x512xf32>
    %32 = arith.addf %24, %31 : vector<16x512xf32>
    %c15_i32 = arith.constant 15 : i32
    %33 = tpu.dynamic_rotate %10 by %c15_i32 dim 1 : vector<16x512xf32>, i32 -> vector<16x512xf32>
    %34 = vector.extract_strided_slice %13 {offsets = [2, 0], sizes = [1, 512], strides = [1, 1]} : vector<9x512xf32> to vector<1x512xf32>
    %35 = vector.broadcast %34 : vector<1x512xf32> to vector<16x512xf32>
    %36 = arith.mulf %33, %35 : vector<16x512xf32>
    %37 = vector.extract_strided_slice %12 {offsets = [0, 2], sizes = [16, 1], strides = [1, 1]} : vector<16x9xf32> to vector<16x1xf32>
    %38 = vector.broadcast %37 : vector<16x1xf32> to vector<16x512xf32>
    %39 = arith.mulf %36, %38 : vector<16x512xf32>
    %40 = arith.addf %32, %39 : vector<16x512xf32>
    %c1_i32 = arith.constant 1 : i32
    %41 = tpu.dynamic_rotate %10 by %c1_i32 dim 1 : vector<16x512xf32>, i32 -> vector<16x512xf32>
    %42 = vector.extract_strided_slice %13 {offsets = [3, 0], sizes = [1, 512], strides = [1, 1]} : vector<9x512xf32> to vector<1x512xf32>
    %43 = vector.broadcast %42 : vector<1x512xf32> to vector<16x512xf32>
    %44 = arith.mulf %41, %43 : vector<16x512xf32>
    %45 = vector.extract_strided_slice %12 {offsets = [0, 3], sizes = [16, 1], strides = [1, 1]} : vector<16x9xf32> to vector<16x1xf32>
    %46 = vector.broadcast %45 : vector<16x1xf32> to vector<16x512xf32>
    %47 = arith.mulf %44, %46 : vector<16x512xf32>
    %48 = arith.addf %40, %47 : vector<16x512xf32>
    %c511_i32 = arith.constant 511 : i32
    %49 = tpu.dynamic_rotate %10 by %c511_i32 dim 1 : vector<16x512xf32>, i32 -> vector<16x512xf32>
    %50 = vector.extract_strided_slice %13 {offsets = [5, 0], sizes = [1, 512], strides = [1, 1]} : vector<9x512xf32> to vector<1x512xf32>
    %51 = vector.broadcast %50 : vector<1x512xf32> to vector<16x512xf32>
    %52 = arith.mulf %49, %51 : vector<16x512xf32>
    %53 = vector.extract_strided_slice %12 {offsets = [0, 5], sizes = [16, 1], strides = [1, 1]} : vector<16x9xf32> to vector<16x1xf32>
    %54 = vector.broadcast %53 : vector<16x1xf32> to vector<16x512xf32>
    %55 = arith.mulf %52, %54 : vector<16x512xf32>
    %56 = arith.addf %48, %55 : vector<16x512xf32>
    %c497_i32 = arith.constant 497 : i32
    %57 = tpu.dynamic_rotate %10 by %c497_i32 dim 1 : vector<16x512xf32>, i32 -> vector<16x512xf32>
    %58 = vector.extract_strided_slice %13 {offsets = [6, 0], sizes = [1, 512], strides = [1, 1]} : vector<9x512xf32> to vector<1x512xf32>
    %59 = vector.broadcast %58 : vector<1x512xf32> to vector<16x512xf32>
    %60 = arith.mulf %57, %59 : vector<16x512xf32>
    %61 = vector.extract_strided_slice %12 {offsets = [0, 6], sizes = [16, 1], strides = [1, 1]} : vector<16x9xf32> to vector<16x1xf32>
    %62 = vector.broadcast %61 : vector<16x1xf32> to vector<16x512xf32>
    %63 = arith.mulf %60, %62 : vector<16x512xf32>
    %64 = arith.addf %56, %63 : vector<16x512xf32>
    %c496_i32 = arith.constant 496 : i32
    %65 = tpu.dynamic_rotate %10 by %c496_i32 dim 1 : vector<16x512xf32>, i32 -> vector<16x512xf32>
    %66 = vector.extract_strided_slice %13 {offsets = [7, 0], sizes = [1, 512], strides = [1, 1]} : vector<9x512xf32> to vector<1x512xf32>
    %67 = vector.broadcast %66 : vector<1x512xf32> to vector<16x512xf32>
    %68 = arith.mulf %65, %67 : vector<16x512xf32>
    %69 = vector.extract_strided_slice %12 {offsets = [0, 7], sizes = [16, 1], strides = [1, 1]} : vector<16x9xf32> to vector<16x1xf32>
    %70 = vector.broadcast %69 : vector<16x1xf32> to vector<16x512xf32>
    %71 = arith.mulf %68, %70 : vector<16x512xf32>
    %72 = arith.addf %64, %71 : vector<16x512xf32>
    %c495_i32 = arith.constant 495 : i32
    %73 = tpu.dynamic_rotate %10 by %c495_i32 dim 1 : vector<16x512xf32>, i32 -> vector<16x512xf32>
    %74 = vector.extract_strided_slice %13 {offsets = [8, 0], sizes = [1, 512], strides = [1, 1]} : vector<9x512xf32> to vector<1x512xf32>
    %75 = vector.broadcast %74 : vector<1x512xf32> to vector<16x512xf32>
    %76 = arith.mulf %73, %75 : vector<16x512xf32>
    %77 = vector.extract_strided_slice %12 {offsets = [0, 8], sizes = [16, 1], strides = [1, 1]} : vector<16x9xf32> to vector<16x1xf32>
    %78 = vector.broadcast %77 : vector<16x1xf32> to vector<16x512xf32>
    %79 = arith.mulf %76, %78 : vector<16x512xf32>
    %80 = arith.addf %72, %79 : vector<16x512xf32>
    %c0_11 = arith.constant 0 : index
    %c0_12 = arith.constant 0 : index
    %81 = vector.load %arg5[%c0_11, %c0_12] : memref<16x1xf32, #tpu.memory_space<vmem>>, vector<16x1xf32>
    %82 = vector.broadcast %81 : vector<16x1xf32> to vector<16x512xf32>
    %83 = arith.addf %80, %82 : vector<16x512xf32>
    %cst_13 = arith.constant 0.000000e+00 : f32
    %cst_14 = arith.constant 6.000000e+00 : f32
    %84 = vector.broadcast %cst_13 : f32 to vector<16x512xf32>
    %85 = arith.maximumf %84, %83 : vector<16x512xf32>
    %86 = vector.broadcast %cst_14 : f32 to vector<16x512xf32>
    %87 = arith.minimumf %86, %85 : vector<16x512xf32>
    %88 = tpu.concatenate %87, %11 in 0 : vector<16x512xf32>, vector<8x512xf32> -> vector<24x512xf32>
    %89 = arith.truncf %88 : vector<24x512xf32> to vector<24x512xbf16>
    %c0_15 = arith.constant 0 : index
    %c0_16 = arith.constant 0 : index
    %90 = vector.load %arg7[%c0_15, %c0_16] : memref<512x128xbf16, #tpu.memory_space<vmem>>, vector<512x128xbf16>
    %cst_17 = arith.constant dense<0.000000e+00> : vector<24x128xf32>
    %91 = tpu.matmul %89, %90, %cst_17 {dimension_numbers = #tpu.dot_dimension_numbers<[1], [0], [0], [1], [0, 0, 1, 1], [], []>} : vector<24x512xbf16>, vector<512x128xbf16>, vector<24x128xf32> -> vector<24x128xf32>
    %c0_18 = arith.constant 0 : index
    %c0_19 = arith.constant 0 : index
    %92 = vector.load %arg8[%c0_18, %c0_19] : memref<8x24xbf16, #tpu.memory_space<vmem>>, vector<8x24xbf16>
    %93 = arith.truncf %91 : vector<24x128xf32> to vector<24x128xbf16>
    %cst_20 = arith.constant dense<0.000000e+00> : vector<8x128xf32>
    %94 = tpu.matmul %92, %93, %cst_20 {dimension_numbers = #tpu.dot_dimension_numbers<[1], [0], [0], [1], [0, 0, 1, 1], [], []>} : vector<8x24xbf16>, vector<24x128xbf16>, vector<8x128xf32> -> vector<8x128xf32>
    %c0_21 = arith.constant 0 : index
    %c0_22 = arith.constant 0 : index
    %95 = vector.load %arg9[%c0_21, %c0_22] : memref<8x1xf32, #tpu.memory_space<vmem>>, vector<8x1xf32>
    %96 = vector.broadcast %95 : vector<8x1xf32> to vector<8x128xf32>
    %97 = arith.addf %94, %96 : vector<8x128xf32>
    %98 = arith.negf %97 : vector<8x128xf32>
    %99 = math.exp %98 : vector<8x128xf32>
    %cst_23 = arith.constant 1.000000e+00 : f32
    %100 = vector.broadcast %cst_23 : f32 to vector<8x128xf32>
    %101 = arith.addf %100, %99 : vector<8x128xf32>
    %102 = arith.divf %100, %101 : vector<8x128xf32>
    %103 = arith.mulf %97, %102 : vector<8x128xf32>
    %c0_24 = arith.constant 0 : index
    %c0_25 = arith.constant 0 : index
    %104 = vector.load %arg10[%c0_24, %c0_25] : memref<8x128xf32, #tpu.memory_space<vmem>>, vector<8x128xf32>
    tpu.vector_store %arg10[%c0_24, %c0_25], %103 {strides = array<i32>} : memref<8x128xf32, #tpu.memory_space<vmem>>, vector<8x128xf32>,
    return
  }
  func.func @transform_0(%arg0: i32) -> (i32, i32) {
    %c0_i32 = arith.constant 0 : i32
    %c0_i32_0 = arith.constant 0 : i32
    return %c0_i32, %arg0 : i32, i32
  }
  func.func @transform_1(%arg0: i32) -> (i32, i32) {
    %c0_i32 = arith.constant 0 : i32
    %c0_i32_0 = arith.constant 0 : i32
    %c0_i32_1 = arith.constant 0 : i32
    return %c0_i32, %c0_i32_0 : i32, i32
  }
  func.func @transform_2(%arg0: i32) -> (i32, i32) {
    %c0_i32 = arith.constant 0 : i32
    %c0_i32_0 = arith.constant 0 : i32
    %c0_i32_1 = arith.constant 0 : i32
    return %c0_i32, %c0_i32_0 : i32, i32
  }
  func.func @transform_3(%arg0: i32) -> (i32, i32) {
    %c0_i32 = arith.constant 0 : i32
    %c0_i32_0 = arith.constant 0 : i32
    %c0_i32_1 = arith.constant 0 : i32
    return %c0_i32, %c0_i32_0 : i32, i32
  }
  func.func @transform_4(%arg0: i32) -> (i32, i32) {
    %c0_i32 = arith.constant 0 : i32
    %c0_i32_0 = arith.constant 0 : i32
    %c0_i32_1 = arith.constant 0 : i32
    return %c0_i32, %c0_i32_0 : i32, i32
  }
  func.func @transform_5(%arg0: i32) -> (i32, i32) {
    %c0_i32 = arith.constant 0 : i32
    %c0_i32_0 = arith.constant 0 : i32
    %c0_i32_1 = arith.constant 0 : i32
    return %c0_i32, %c0_i32_0 : i32, i32
  }
  func.func @transform_6(%arg0: i32) -> (i32, i32) {
    %c0_i32 = arith.constant 0 : i32
    %c0_i32_0 = arith.constant 0 : i32
    %c0_i32_1 = arith.constant 0 : i32
    return %c0_i32, %c0_i32_0 : i32, i32
  }
  func.func @transform_7(%arg0: i32) -> (i32, i32) {
    %c0_i32 = arith.constant 0 : i32
    %c0_i32_0 = arith.constant 0 : i32
    %c0_i32_1 = arith.constant 0 : i32
    return %c0_i32, %c0_i32_0 : i32, i32
  }
  func.func @transform_8(%arg0: i32) -> (i32, i32) {
    %c0_i32 = arith.constant 0 : i32
    %c0_i32_0 = arith.constant 0 : i32
    %c0_i32_1 = arith.constant 0 : i32
    return %c0_i32, %c0_i32_0 : i32, i32
  }
  func.func @transform_9(%arg0: i32) -> (i32, i32) {
    %c0_i32 = arith.constant 0 : i32
    %c0_i32_0 = arith.constant 0 : i32
    return %c0_i32, %arg0 : i32, i32
  }
}

</mosaic_0001>

<bundles_post_ra>
// kernel: tpu_custom_call.1
= control target key start
LH: loop header
LB: loop body
LE: loop exit
PB: predicated region body
PF: predicated region fallthrough
CT: control target
= control target key end

     0   :  { %14 = vsyncpa [#allocation3], 0  ;;  %s2578_s0 = inlined_call_operand.vmem [shape: bf16[4,512], index: 0, kind: input, shape index: {}]   ;;  %s2579_s1 = inlined_call_operand.vmem [shape: bf16[24,4], index: 1, kind: input, shape index: {}]   ;;  %s2580_s2 = inlined_call_operand.vmem [shape: f32[24,1], index: 2, kind: input, shape index: {}]   ;;  %s2581_s3 = inlined_call_operand.hbm [shape: f32[16,9], index: 3, kind: input, shape index: {}]   ;;  %s2582_s4 = inlined_call_operand.vmem [shape: f32[16,1], index: 4, kind: input, shape index: {}]   ;;  %s2583_s5 = inlined_call_operand.vmem [shape: f32[9,512], index: 5, kind: input, shape index: {}]   ;;  %s2584_s6 = inlined_call_operand.hbm [shape: bf16[512,128], index: 6, kind: input, shape index: {}]   ;;  %s2585_s7 = inlined_call_operand.vmem [shape: bf16[8,24], index: 7, kind: input, shape index: {}]   ;;  %s2586_s8 = inlined_call_operand.vmem [shape: f32[8,1], index: 8, kind: input, shape index: {}]   ;;  %s2587_s9 = inlined_call_operand.hbm [shape: f32[8,128], index: 9, kind: output, shape index: {}]  }
   0x1   :  { %15 = vsyncpa [#allocation6], 0 }
   0x2   :  { %16 = vsyncpa [#allocation4], 0  ;;  %s1602_s30 = smov [#allocation2]  }
   0x3   :  { %s28_s10 = sshll.u32 %s1602_s30, 4  ;;  %s29_s10 = int_to_ptr.vmem [resolvable:$true] %s28_s10 }
   0x4   :  { %s1544_s11 = scalar_lea.vmem %s29_s10, 256  ;;  %p1549_p1 = scmp.lt.s32.totalorder %s29_s10, %s29_s10 }
   0x5   :  { %p1545_p0 = scmp.ne.s32.totalorder %s29_s10, %s1544_s11  ;;  %p1550_p2 = scmp.lt.s32.totalorder %s1544_s11, %s1544_s11 }
   0x7   :  { %p1551_p3 = por %p1550_p2, %p1549_p1 }
   0x9   :  { %p1552_p4 = pnand %p1551_p3, %p1545_p0 }
   0xb   :  { %1555 = shalt.err (!%p1552_p4)
}
   0xc   :  { %s1603_s12 = smov 128   ;;  %s1604_s13 = smov 8  }
   0xd   :  { %34 = dma.hbm_to_vmem [thread:$0]  %s2581_s3, 256, %s29_s10, [#allocation3], %s1603_s12, %s1603_s12, %s1604_s13  }
   0xe   :  { %s1605_s16 = smov [#allocation5]  }
   0xf   :  { %s44_s17 = sshll.u32 %s1605_s16, 4  ;;  %s45_s17 = int_to_ptr.vmem [resolvable:$true] %s44_s17 }
  0x10   :  { %s1564_s18 = scalar_lea.vmem %s45_s17, 4096  ;;  %p1569_p6 = scmp.lt.s32.totalorder %s45_s17, %s45_s17 }
  0x11   :  { %p1565_p5 = scmp.ne.s32.totalorder %s45_s17, %s1564_s18  ;;  %p1570_p7 = scmp.lt.s32.totalorder %s1564_s18, %s1564_s18 }
  0x13   :  { %p1571_p8 = por %p1570_p7, %p1569_p6 }
  0x15   :  { %p1572_p9 = pnand %p1571_p8, %p1565_p5 }
  0x17   :  { %1575 = shalt.err (!%p1572_p9)
}
  0x18   :  { %s1606_s19 = smov 64   ;;  %s1607_s20 = smov 4  }
  0x19   :  { %50 = dma.hbm_to_vmem [thread:$0]  %s2584_s6, 4096, %s45_s17, [#allocation6], %s1606_s19, %s1606_s19, %s1607_s20  }
  0x1a   :  { %1596 = dma.done.wait [#allocation3], 256  }
  0x1b   :  { %1597 = vsyncadd [#allocation3], 4294967040 }
  0x1c   :  { %1598 = dma.done.wait [#allocation6], 4096  }
  0x1d   :  { %1599 = vsyncadd [#allocation6], 4294963200  ;;  %v97_v0 = vlaneseq  ;;  %v1608_v1 = vmov 1983009808   ;;  %v1609_v3 = vmov 0   ;;  %v1610_v5 = vmov 1  }
  0x1e   :  { %v95_v2 = vunpack.c.l.s4 %v1608_v1  ;;  %162 = vmatprep.mubr.bf16.mxu0 %v1609_v3  ;;  %213 = vmatprep.mubr.bf16.mxu1 %v1609_v3  ;;  %v1611_v8 = vmov 4   ;;  %v62_v9 = vld [vmem:[%s2578_s0] sm:$0xff]  ;;  %vm117_vm0 = vcmask 1041408   ;;  %vm110_vm1 = vcmask 31744   ;;  %v249_v16 = vld [vmem:[#allocation2 + $0x8] sm:$0xff]  ;;  %s1619_s30 = smov 17  }
  0x1f   :  { %v1688_v4 = vshrl.u32 %v97_v0, 7  ;;  %1481 = vset.pattern.permute.xlu0 %v1610_v5  ;;  %1479 = vset.pattern.permute.xlu1 %v1611_v8  ;;  %v93_v11 = vcombine.high %v62_v9, %v62_v9  ;;  %v248_v12 = vld [vmem:[#allocation2] sm:$0xff]  ;;  %v1612_v20 = vmov 2   ;;  %v1613_v21 = vmov 3   ;;  %v67_v27 = vld [vmem:[%s2580_s2 + $0x8] sm:$0xff]  ;;  %s1620_s10 = smov 15  }
  0x20   :  { %v96_v6 = vunpack.c.0.s8 %v95_v2  ;;  %401 = vperm.xlu0 %1481, %v248_v12   ;;  %260 = vperm.xlu1 %1479, %v248_v12   ;;  %v1498_v19 = vld [vmem:[%s2579_s1] sm:$0xff]   ;;  %v1614_v22 = vmov 5   ;;  %v1615_v23 = vmov 6   ;;  %v1616_v24 = vmov 7   ;;  %v1499_v28 = vld [vmem:[%s2579_s1 + $0x8] ss:$0 sps:$4 sm:$0xff]  }
  0x21   :  { %v1617_v25 = vmov 8   ;;  %v66_v26 = vld [vmem:[%s2580_s2] sm:$0xff]  ;;  %s1618_s1 = smov 16   ;;  %s1621_s11 = smov 1   ;;  %vm1627_vm10 = vmmov 0   ;;  %vm1271_vm11 = vcmask 1043456  }
  0x22   :  { %v99_v7 = vsub.s32 %v96_v6, %v1688_v4  ;;  %s1622_s12 = smov 127   ;;  %s1623_s13 = smov 113   ;;  %vm1267_vm12 = vcmask 195584  }
  0x23   :  { %s1624_s14 = smov 112   ;;  %s1625_s15 = smov 111  }
  0x24   :  { %v100_v10 = vrot.slane %v62_v9, %v99_v7  ;;  %v107_v15 = vrot.slane %v93_v11, %v99_v7  ;;  %1484 = vset.pattern.permute.xlu0 %v1612_v20  ;;  %265 = vperm.xlu1 %1479, %v249_v16  }
  0x25   :  { %478 = vperm.xlu0 %1484, %v249_v16  }
  0x26   :  { %v108_v13 = vcombine.high %v100_v10, %v100_v10  ;;  %v119_v14 = vsel %vm117_vm0, %v100_v10, 0  ;;  %v109_v17 = vcombine.high %v107_v15, %v107_v15  ;;  %v125_v18 = vsel %vm117_vm0, %v107_v15, 0 }
  0x28   :  { %1341 = vmatprep.subr.msk.bf16.mxu0 %vm117_vm0, %v108_v13  ;;  %1344 = vmatprep.subr.msk.bf16.mxu1 %vm117_vm0, %v109_v17 }
  0x29   :  { %145 = vmatpush1.bf16.msra.mxu0 %v119_v14  ;;  %196 = vmatpush1.bf16.msra.mxu1 %v125_v18 }
  0x2a   :  { %1485 = vset.pattern.permute.xlu0 %v1613_v21  ;;  %1480 = vset.pattern.permute.xlu1 %v1609_v3 }
  0x2b   :  { %547 = vperm.xlu0 %1485, %v248_v12   ;;  %332 = vperm.xlu1 %1480, %v249_v16  }
  0x2c   :  { %1342 = vmatmul.mubr.msk.bf16.vlgmr.msra.gmra.mxu0 %vm110_vm1, %v1498_v19  ;;  %1345 = vmatmul.mubr.msk.bf16.vlgmr.msra.gmra.mxu1 %vm110_vm1, %v1498_v19  ;;  %v1884_v19 = vand.u32 127, %v97_v0  ;;  %v1899_v0 = vld [vmem:[%s2583_s5 + $0x8] sm:$0xff] }
  0x2d   :  { %172 = vmatprep.mubr.bf16.mxu0 %v1609_v3  ;;  %223 = vmatprep.mubr.bf16.mxu1 %v1609_v3 }
  0x2e   :  { %vm294_vm2 = vcmp.lt.s32.totalorder %v1884_v19, 17  ;;  %vm440_vm3 = vcmp.lt.s32.totalorder %v1884_v19, 15  ;;  %vm586_vm4 = vcmp.lt.s32.totalorder %v1884_v19, 127  ;;  %vm367_vm5 = vcmp.lt.s32.totalorder %v1884_v19, 16 }
  0x2f   :  { %1488 = vset.pattern.permute.xlu0 %v1614_v22  ;;  %1482 = vset.pattern.permute.xlu1 %v1610_v5  ;;  %vm732_vm6 = vcmp.lt.s32.totalorder %v1884_v19, 112  ;;  %vm513_vm7 = vcmp.lt.s32.totalorder %v1884_v19, 1  ;;  %vm659_vm8 = vcmp.lt.s32.totalorder %v1884_v19, 113  ;;  %vm805_vm9 = vcmp.lt.s32.totalorder %v1884_v19, 111 }
  0x30   :  { %624 = vperm.xlu0 %1488, %v249_v16   ;;  %405 = vperm.xlu1 %1482, %v249_v16  }
  0x34   :  { %1489 = vset.pattern.permute.xlu0 %v1615_v23  ;;  %1483 = vset.pattern.permute.xlu1 %v1612_v20  ;;  %v863_v20 = vld [vmem:[%s2582_s4 + $0x8] sm:$0xff] }
  0x35   :  { %693 = vperm.xlu0 %1489, %v248_v12   ;;  %474 = vperm.xlu1 %1483, %v248_v12  }
  0x36   :  { %1343 = vmatmul.mubr.msk.bf16.gmra.mxu0 %vm110_vm1, %v1499_v28  ;;  %1346 = vmatmul.mubr.msk.bf16.gmra.mxu1 %vm110_vm1, %v1499_v28 }
  0x39   :  { %1492 = vset.pattern.permute.xlu0 %v1616_v24  ;;  %1486 = vset.pattern.permute.xlu1 %v1613_v21  ;;  %v1894_v21 = vsub.s32 0, %v1688_v4 }
  0x3a   :  { %770 = vperm.xlu0 %1492, %v249_v16   ;;  %551 = vperm.xlu1 %1486, %v249_v16  }
  0x3b   :  { %v1910_v28 = vrot.slane %v1899_v0, %v1894_v21 }
  0x3e   :  { %1493 = vset.pattern.permute.xlu0 %v1617_v25  ;;  %1487 = vset.pattern.permute.xlu1 %v1614_v22  ;;  %v1500_v22 = vld [vmem:[#allocation5 + $0x78] sm:$0xff]  }
  0x3f   :  { %839 = vperm.xlu0 %1493, %v248_v12   ;;  %620 = vperm.xlu1 %1487, %v248_v12  }
  0x40   :  { %1385 = vmatprep.subr.bf16.mxu0 %v1500_v22 }
  0x43   :  { %1494 = vset.pattern.permute.xlu0 %v1609_v3  ;;  %1490 = vset.pattern.permute.xlu1 %v1615_v23  ;;  %v1501_v23 = vld [vmem:[#allocation5 + $0xf8] sm:$0xff]  }
  0x44   :  { %71 = vperm.xlu0 %1494, %v66_v26   ;;  %697 = vperm.xlu1 %1490, %v249_v16  }
  0x45   :  { %1413 = vmatprep.subr.bf16.mxu1 %v1501_v23 }
  0x48   :  { %76 = vperm.xlu0 %1494, %v67_v27   ;;  %1491 = vset.pattern.permute.xlu1 %v1616_v24  ;;  %v1502_v24 = vld [vmem:[#allocation5 + $0x38] sm:$0xff]  }
  0x49   :  { %766 = vperm.xlu1 %1491, %v248_v12   ;;  %1386 = vmatpush3.bf16.msra.mxu0 %v1502_v24 }
  0x4c   :  { %328 = vperm.xlu0 %1494, %v248_v12  }
  0x4d   :  { %1495 = vset.pattern.permute.xlu1 %v1617_v25  ;;  %v1503_v25 = vld [vmem:[#allocation5 + $0xb8] sm:$0xff]  }
  0x4e   :  { %843 = vperm.xlu1 %1495, %v249_v16   ;;  %1414 = vmatpush3.bf16.msra.mxu1 %v1503_v25  ;;  %v1517_v25 = vld [vmem:[#allocation5 + $0xd8] sm:$0xff]  }
  0x52   :  { %1496 = vset.pattern.permute.xlu1 %v1609_v3 }
  0x9b   :  { %v1719_v29 = vpop.permute.xlu0 %401  ;;  %v1799_v59 = vpop.permute.xlu1 %260 }
  0x9f   :  { %v1809_v1 = vpop.permute.xlu1 %265 }
  0xa0   :  { %v1721_v30 = vpop.permute.xlu0 %478 }
  0xa1   :  { %2611 = vst [vmem:[#allocation11_spill] sm:$0xff] %v1721_v30 }
  0xa6   :  { %v1723_v31 = vpop.permute.xlu0 %547  ;;  %v1817_v5 = vpop.permute.xlu1 %332 }
  0xa7   :  { %2615 = vst [vmem:[#allocation15_spill] sm:$0xff] %v1817_v5 }
  0xab   :  { %v1725_v32 = vpop.permute.xlu0 %624  ;;  %v1829_v7 = vpop.permute.xlu1 %405 }
  0xac   :  { %2612 = vst [vmem:[#allocation12_spill] sm:$0xff] %v1725_v32  ;;  %2617 = vst [vmem:[#allocation17_spill] sm:$0xff] %v1829_v7 }
  0xb0   :  { %v1727_v33 = vpop.permute.xlu0 %693  ;;  %v1835_v8 = vpop.permute.xlu1 %474 }
  0xb5   :  { %v1729_v34 = vpop.permute.xlu0 %770  ;;  %v1845_v9 = vpop.permute.xlu1 %551 }
  0xb6   :  { %2613 = vst [vmem:[#allocation13_spill] sm:$0xff] %v1729_v34  ;;  %2618 = vst [vmem:[#allocation18_spill] sm:$0xff] %v1845_v9 }
  0xba   :  { %v1731_v35 = vpop.permute.xlu0 %839  ;;  %v1851_v12 = vpop.permute.xlu1 %620 }
  0xbf   :  { %v72_v36 = vpop.permute.xlu0 %71  ;;  %v1861_v14 = vpop.permute.xlu1 %697 }
  0xc0   :  { %2619 = vst [vmem:[#allocation19_spill] sm:$0xff] %v1861_v14 }
  0xc3   :  { %v77_v52 = vpop.permute.xlu0 %76 }
  0xc4   :  { %v1869_v16 = vpop.permute.xlu1 %766 }
  0xc7   :  { %v1881_v18 = vpop.permute.xlu0 %328 }
  0xc9   :  { %v1879_v17 = vpop.permute.xlu1 %843 }
  0xca   :  { %2621 = vst [vmem:[#allocation21_spill] sm:$0xff] %v1879_v17 }
  0xec   :  { %v164_v37 = vpop.f32.mrf.mxu0  ;;  %v215_v40 = vpop.f32.mrf.mxu1 }
  0xed   :  { %v165_v38 = vadd.f32 %v164_v37, %v72_v36  ;;  %v216_v45 = vadd.f32 %v215_v40, %v72_v36  ;;  %v1505_v37 = vld [vmem:[#allocation5 + $0xf0] sm:$0xff]  }
  0xee   :  { %v166_v39 = vpop.f32.mrf.mxu0  ;;  %v217_v49 = vpop.f32.mrf.mxu1  ;;  %v1507_v40 = vld [vmem:[#allocation5 + $0xb0] sm:$0xff]   ;;  %1415 = vmatprep.subr.bf16.mxu1 %v1505_v37  ;;  %v1519_v37 = vld [vmem:[#allocation5 + $0x98] sm:$0xff]  }
  0xef   :  { %v232_v41 = vmax.f32 %v165_v38, 0.0  ;;  %v167_v42 = vadd.f32 %v166_v39, %v72_v36  ;;  %v234_v47 = vmax.f32 %v216_v45, 0.0  ;;  %v218_v50 = vadd.f32 %v217_v49, %v72_v36  ;;  %v1504_v36 = vld [vmem:[#allocation5 + $0x70] sm:$0xff]   ;;  %v1915_v38 = vld [vmem:[%s2583_s5 + $0x10] sm:$0xff]  ;;  %1416 = vmatpush3.bf16.msra.mxu1 %v1507_v40  ;;  %v1508_v49 = vld [vmem:[#allocation5 + $0x68] sm:$0xff]  }
  0xf0   :  { %v168_v51 = vpop.f32.mrf.mxu0  ;;  %v219_v61 = vpop.f32.mrf.mxu1  ;;  %v1506_v39 = vld [vmem:[#allocation5 + $0x30] sm:$0xff]   ;;  %1387 = vmatprep.subr.bf16.mxu0 %v1504_v36  ;;  %v1518_v36 = vld [vmem:[#allocation5 + $0x18] sm:$0xff]  }
  0xf1   :  { %v1733_v43 = vmin.f32 %v232_v41, 6.0  ;;  %v233_v44 = vmax.f32 %v167_v42, 0.0  ;;  %v1745_v48 = vmin.f32 %v234_v47, 6.0  ;;  %v169_v53 = vadd.f32 %v168_v51, %v77_v52  ;;  %1388 = vmatpush3.bf16.msra.mxu0 %v1506_v39  ;;  %v1510_v51 = vld [vmem:[#allocation5 + $0x28] sm:$0xff]  }
  0xf2   :  { %v235_v54 = vmax.f32 %v218_v50, 0.0  ;;  %v170_v58 = vpop.f32.mrf.mxu0  ;;  %v220_v63 = vadd.f32 %v219_v61, %v77_v52  ;;  %v221_v10 = vpop.f32.mrf.mxu1  ;;  %v1927_v47 = vrot.slane %v1915_v38, %v1894_v21  ;;  %v1509_v50 = vld [vmem:[#allocation5 + $0xe8] sm:$0xff]   ;;  %1389 = vmatprep.subr.bf16.mxu0 %v1508_v49  ;;  %v1522_v49 = vld [vmem:[#allocation5 + $0x10] sm:$0xff]  }
  0xf3   :  { %351 = vrot.lane.b32.xlu1 %v1733_v43, %s1618_s1  ;;  %276 = vrot.lane.b32.xlu0 %v1733_v43, %s1619_s30  ;;  %v1739_v46 = vmin.f32 %v233_v44, 6.0  ;;  %v236_v55 = vmax.f32 %v169_v53, 0.0  ;;  %v171_v60 = vadd.f32 %v170_v58, %v77_v52  ;;  %v222_v11 = vadd.f32 %v221_v10, %v77_v52  ;;  %v1511_v52 = vld [vmem:[#allocation5 + $0xa8] sm:$0xff]   ;;  %v1515_v10 = vld [vmem:[#allocation5 + $0xa0] sm:$0xff]  }
  0xf4   :  { %v1775_v56 = vmin.f32 %v235_v54, 6.0  ;;  %v238_v3 = vmax.f32 %v220_v63, 0.0  ;;  %2622 = vst [vmem:[#allocation22_spill] sm:$0xff] %v1927_v47  ;;  %1417 = vmatprep.subr.bf16.mxu1 %v1509_v50  ;;  %v1513_v63 = vld [vmem:[#allocation5 + $0xe0] sm:$0xff]   ;;  %v1523_v50 = vld [vmem:[#allocation5 + $0x90] sm:$0xff]  }
  0xf5   :  { %v1781_v57 = vmin.f32 %v236_v55, 6.0  ;;  %v237_v62 = vmax.f32 %v171_v60, 0.0  ;;  %v239_v13 = vmax.f32 %v222_v11, 0.0  ;;  %v269_v53 = vmul.f32 %v1799_v59, %v1739_v46  ;;  %1390 = vmatpush3.bf16.msra.mxu0 %v1510_v51  ;;  %1418 = vmatpush3.bf16.msra.mxu1 %v1511_v52 }
  0xf6   :  { %v1823_v6 = vmin.f32 %v238_v3, 6.0  ;;  %v1514_v3 = vld [vmem:[#allocation5 + $0x20] sm:$0xff]   ;;  %v270_v11 = vmul.f32 %v1799_v59, %v1745_v48  ;;  %1419 = vmatprep.subr.bf16.mxu1 %v1513_v63  ;;  %v862_v63 = vld [vmem:[%s2582_s4] sm:$0xff] }
  0xf7   :  { %424 = vrot.lane.b32.xlu1 %v1733_v43, %s1620_s10  ;;  %280 = vrot.lane.b32.xlu0 %v1739_v46, %s1619_s30  ;;  %2614 = vst [vmem:[#allocation14_spill] sm:$0xff] %v1781_v57  ;;  %v1815_v2 = vmin.f32 %v237_v62, 6.0  ;;  %v1863_v15 = vmin.f32 %v239_v13, 6.0 }
  0xf8   :  { %2616 = vst [vmem:[#allocation16_spill] sm:$0xff] %v1823_v6 }
  0xf9   :  { %2620 = vst [vmem:[#allocation20_spill] sm:$0xff] %v1863_v15  ;;  %1420 = vmatpush3.bf16.msra.mxu1 %v1515_v10  ;;  %v1527_v10 = vld [vmem:[#allocation5 + $0x88] sm:$0xff]  }
  0xfa   :  { %1421 = vmatprep.subr.bf16.mxu1 %v1517_v25  ;;  %v1998_v25 = vpop.f32.mrf.mxu1 }
  0xfb   :  { %497 = vrot.lane.b32.xlu1 %v1733_v43, %s1621_s11  ;;  %284 = vrot.lane.b32.xlu0 %v1745_v48, %s1619_s30  ;;  %2624 = vst [vmem:[#allocation24_spill] sm:$0xff] %v1998_v25 }
  0xfd   :  { %1422 = vmatpush3.bf16.msra.mxu1 %v1519_v37 }
  0xff   :  { %570 = vrot.lane.b32.xlu1 %v1733_v43, %s1622_s12  ;;  %428 = vrot.lane.b32.xlu0 %v1739_v46, %s1620_s10 }
 0x103   :  { %643 = vrot.lane.b32.xlu1 %v1733_v43, %s1623_s13  ;;  %432 = vrot.lane.b32.xlu0 %v1745_v48, %s1620_s10 }
 0x107   :  { %716 = vrot.lane.b32.xlu1 %v1733_v43, %s1624_s14  ;;  %574 = vrot.lane.b32.xlu0 %v1739_v46, %s1622_s12 }
 0x10b   :  { %789 = vrot.lane.b32.xlu1 %v1733_v43, %s1625_s15  ;;  %578 = vrot.lane.b32.xlu0 %v1745_v48, %s1622_s12 }
 0x10f   :  { %355 = vrot.lane.b32.xlu1 %v1739_v46, %s1618_s1  ;;  %720 = vrot.lane.b32.xlu0 %v1739_v46, %s1624_s14 }
 0x113   :  { %359 = vrot.lane.b32.xlu1 %v1745_v48, %s1618_s1  ;;  %724 = vrot.lane.b32.xlu0 %v1745_v48, %s1624_s14 }
 0x117   :  { %501 = vrot.lane.b32.xlu1 %v1739_v46, %s1621_s11  ;;  %288 = vrot.lane.b32.xlu0 %v1775_v56, %s1619_s30 }
 0x11b   :  { %505 = vrot.lane.b32.xlu1 %v1745_v48, %s1621_s11  ;;  %353 = vrot.lane.b32.xlu0 %v1781_v57, %s1618_s1 }
 0x11f   :  { %647 = vrot.lane.b32.xlu1 %v1739_v46, %s1623_s13  ;;  %436 = vrot.lane.b32.xlu0 %v1775_v56, %s1620_s10 }
 0x123   :  { %651 = vrot.lane.b32.xlu1 %v1745_v48, %s1623_s13  ;;  %499 = vrot.lane.b32.xlu0 %v1781_v57, %s1621_s11 }
 0x127   :  { %793 = vrot.lane.b32.xlu1 %v1739_v46, %s1625_s15  ;;  %582 = vrot.lane.b32.xlu0 %v1775_v56, %s1622_s12  ;;  %v1512_v46 = vld [vmem:[#allocation5 + $0x60] sm:$0xff]  }
 0x128   :  { %1391 = vmatprep.subr.bf16.mxu0 %v1512_v46  ;;  %v1525_v46 = vld [vmem:[#allocation5 + $0xc8] sm:$0xff]  }
 0x129   :  { %1392 = vmatpush3.bf16.msra.mxu0 %v1514_v3  ;;  %v1526_v3 = vld [vmem:[#allocation5 + $0x8] sm:$0xff]  }
 0x12b   :  { %797 = vrot.lane.b32.xlu1 %v1745_v48, %s1625_s15  ;;  %645 = vrot.lane.b32.xlu0 %v1781_v57, %s1623_s13  ;;  %v1516_v48 = vld [vmem:[#allocation5 + $0x58] sm:$0xff]  }
 0x12c   :  { %1393 = vmatprep.subr.bf16.mxu0 %v1516_v48  ;;  %v1996_v48 = vpop.f32.mrf.mxu0 }
 0x12d   :  { %1394 = vmatpush3.bf16.msra.mxu0 %v1518_v36  ;;  %2623 = vst [vmem:[#allocation23_spill] sm:$0xff] %v1996_v48 }
 0x12f   :  { %278 = vrot.lane.b32.xlu1 %v1781_v57, %s1619_s30  ;;  %728 = vrot.lane.b32.xlu0 %v1775_v56, %s1624_s14 }
 0x133   :  { %363 = vrot.lane.b32.xlu1 %v1775_v56, %s1618_s1  ;;  %791 = vrot.lane.b32.xlu0 %v1781_v57, %s1625_s15 }
 0x137   :  { %426 = vrot.lane.b32.xlu1 %v1781_v57, %s1620_s10  ;;  %357 = vrot.lane.b32.xlu0 %v1815_v2, %s1618_s1 }
 0x13b   :  { %509 = vrot.lane.b32.xlu1 %v1775_v56, %s1621_s11  ;;  %361 = vrot.lane.b32.xlu0 %v1823_v6, %s1618_s1 }
 0x13f   :  { %572 = vrot.lane.b32.xlu1 %v1781_v57, %s1622_s12  ;;  %503 = vrot.lane.b32.xlu0 %v1815_v2, %s1621_s11 }
 0x143   :  { %655 = vrot.lane.b32.xlu1 %v1775_v56, %s1623_s13  ;;  %507 = vrot.lane.b32.xlu0 %v1823_v6, %s1621_s11 }
 0x147   :  { %718 = vrot.lane.b32.xlu1 %v1781_v57, %s1624_s14  ;;  %649 = vrot.lane.b32.xlu0 %v1815_v2, %s1623_s13 }
 0x14b   :  { %801 = vrot.lane.b32.xlu1 %v1775_v56, %s1625_s15  ;;  %653 = vrot.lane.b32.xlu0 %v1823_v6, %s1623_s13 }
 0x14f   :  { %282 = vrot.lane.b32.xlu1 %v1815_v2, %s1619_s30  ;;  %795 = vrot.lane.b32.xlu0 %v1815_v2, %s1625_s15 }
 0x153   :  { %286 = vrot.lane.b32.xlu1 %v1823_v6, %s1619_s30  ;;  %799 = vrot.lane.b32.xlu0 %v1823_v6, %s1625_s15 }
 0x157   :  { %430 = vrot.lane.b32.xlu1 %v1815_v2, %s1620_s10  ;;  %365 = vrot.lane.b32.xlu0 %v1863_v15, %s1618_s1 }
 0x15b   :  { %434 = vrot.lane.b32.xlu1 %v1823_v6, %s1620_s10  ;;  %511 = vrot.lane.b32.xlu0 %v1863_v15, %s1621_s11 }
 0x15f   :  { %576 = vrot.lane.b32.xlu1 %v1815_v2, %s1622_s12  ;;  %657 = vrot.lane.b32.xlu0 %v1863_v15, %s1623_s13  ;;  %s1628_s13 = smov [#allocation7]  }
 0x163   :  { %580 = vrot.lane.b32.xlu1 %v1823_v6, %s1622_s12  ;;  %803 = vrot.lane.b32.xlu0 %v1863_v15, %s1625_s15 }
 0x165   :  { %v1901_v26 = vpop.permute.xlu1 %351  ;;  %v1903_v27 = vpop.permute.xlu0 %276 }
 0x167   :  { %722 = vrot.lane.b32.xlu1 %v1815_v2, %s1624_s14  ;;  %871 = vperm.xlu0 %1494, %v863_v20  }
 0x169   :  { %v1917_v41 = vpop.permute.xlu1 %424  ;;  %v281_v42 = vpop.permute.xlu0 %280 }
 0x16a   :  { %v299_v44 = vsel %vm294_vm2, %v1903_v27, %v281_v42 }
 0x16b   :  { %v320_v45 = vmul.f32 %v1910_v28, %v299_v44  ;;  %726 = vrot.lane.b32.xlu1 %v1823_v6, %s1624_s14  ;;  %v1520_v44 = vld [vmem:[#allocation5 + $0x50] sm:$0xff]  }
 0x16c   :  { %1395 = vmatprep.subr.bf16.mxu0 %v1520_v44  ;;  %v1528_v44 = vld [vmem:[#allocation5 + $0x40] sm:$0xff]  }
 0x16d   :  { %v336_v54 = vmul.f32 %v1881_v18, %v320_v45  ;;  %v1932_v55 = vpop.permute.xlu1 %497  ;;  %v1934_v58 = vpop.permute.xlu0 %284  ;;  %v1521_v45 = vld [vmem:[#allocation5 + $0xd0] sm:$0xff]   ;;  %1396 = vmatpush3.bf16.msra.mxu0 %v1522_v49  ;;  %v68_v49 = vld [vmem:[%s2580_s2 + $0x10] sm:$0xff] }
 0x16e   :  { %v297_v60 = vsel %vm294_vm2, %v281_v42, %v1934_v58  ;;  %1423 = vmatprep.subr.bf16.mxu1 %v1521_v45  ;;  %v1529_v45 = vld [vmem:[#allocation5 + $0xc0] sm:$0xff]  }
 0x16f   :  { %v1939_v61 = vadd.f32 %v336_v54, %v269_v53  ;;  %v321_v62 = vmul.f32 %v1927_v47, %v297_v60  ;;  %290 = vrot.lane.b32.xlu1 %v1863_v15, %s1619_s30  ;;  %1424 = vmatpush3.bf16.msra.mxu1 %v1523_v50  ;;  %v1979_v54 = vsub.s32 2, %v1688_v4  ;;  %v1984_v60 = vsub.s32 1, %v1688_v4  ;;  %v2013_v50 = vpop.f32.mrf.mxu0 }
 0x170   :  { %1425 = vmatprep.subr.bf16.mxu1 %v1525_v46  ;;  %2626 = vst [vmem:[#allocation26_spill] sm:$0xff] %v2013_v50  ;;  %v1531_v46 = vld [vmem:[#allocation5 + $0x80] sm:$0xff]  }
 0x171   :  { %v337_v13 = vmul.f32 %v1881_v18, %v321_v62  ;;  %v1948_v20 = vpop.permute.xlu1 %570  ;;  %v429_v22 = vpop.permute.xlu0 %428  ;;  %v1524_v62 = vld [vmem:[#allocation5 + $0x48] sm:$0xff]   ;;  %v2002_v36 = vrot.slane %v1899_v0, %v1979_v54  ;;  %v2007_v37 = vrot.slane %v1899_v0, %v1984_v60 }
 0x172   :  { %v1953_v23 = vsel %vm440_vm3, %v1917_v41, %v429_v22  ;;  %1397 = vmatprep.subr.bf16.mxu0 %v1524_v62  ;;  %v1530_v62 = vld [vmem:[#allocation5] sm:$0xff]   ;;  %v178_v50 = vpop.f32.mrf.mxu0 }
 0x173   :  { %v1955_v24 = vadd.f32 %v337_v13, %v270_v11  ;;  %438 = vrot.lane.b32.xlu1 %v1863_v15, %s1620_s10  ;;  %1398 = vmatpush3.bf16.msra.mxu0 %v1526_v3  ;;  %2625 = vst [vmem:[#allocation25_spill] sm:$0xff] %v2002_v36 }
 0x174   :  { %1426 = vmatpush3.bf16.msra.mxu1 %v1527_v10  ;;  %1399 = vmatprep.subr.bf16.mxu0 %v1528_v44  ;;  %v466_v44 = vmul.f32 %v2002_v36, %v1953_v23  ;;  %v179_v23 = vpop.f32.mrf.mxu0 }
 0x175   :  { %v1959_v39 = vpop.permute.xlu1 %643  ;;  %v1961_v40 = vpop.permute.xlu0 %432  ;;  %1427 = vmatprep.subr.bf16.mxu1 %v1529_v45  ;;  %v2035_v45 = vsub.s32 5, %v1688_v4 }
 0x176   :  { %v1966_v42 = vsel %vm440_vm3, %v429_v22, %v1961_v40 }
 0x177   :  { %584 = vrot.lane.b32.xlu1 %v1863_v15, %s1622_s12  ;;  %1400 = vmatpush3.bf16.msra.mxu0 %v1530_v62  ;;  %v1261_v62 = vld [vmem:[%s2586_s8] sm:$0xff] }
 0x178   :  { %1428 = vmatpush3.bf16.msra.mxu1 %v1531_v46 }
 0x179   :  { %v1971_v51 = vpop.permute.xlu1 %716  ;;  %v575_v52 = vpop.permute.xlu0 %574 }
 0x17a   :  { %v1976_v53 = vsel %vm586_vm4, %v1948_v20, %v575_v52 }
 0x17b   :  { %730 = vrot.lane.b32.xlu1 %v1863_v15, %s1624_s14  ;;  %v2040_v15 = vrot.slane %v1915_v38, %v1984_v60  ;;  %s1329_s14 = sshll.u32 %s1628_s13, 4  ;;  %s1330_s14 = int_to_ptr.vmem [resolvable:$true] %s1329_s14 }
 0x17c   :  { %p1581_p11 = scmp.lt.s32.totalorder %s1330_s14, %s1330_s14 }
 0x17d   :  { %v1989_v11 = vpop.permute.xlu1 %789  ;;  %v1991_v13 = vpop.permute.xlu0 %578 }
 0x17e   :  { %v589_v22 = vsel %vm586_vm4, %v575_v52, %v1991_v13  ;;  %v2015_v52 = vpop.f32.mrf.mxu1 }
 0x17f   :  { %866 = vperm.xlu1 %1496, %v862_v63   ;;  %2627 = vst [vmem:[#allocation27_spill] sm:$0xff] %v2015_v52  ;;  %v2019_v63 = vrot.slane %v1915_v38, %v1979_v54  ;;  %v2030_v52 = vsub.s32 3, %v1688_v4 }
 0x180   :  { %v229_v17 = vpop.f32.mrf.mxu1 }
 0x181   :  { %2628 = vst [vmem:[#allocation28_spill] sm:$0xff] %v2019_v63  ;;  %v356_v3 = vpop.permute.xlu1 %355  ;;  %v721_v10 = vpop.permute.xlu0 %720  ;;  %v2048_v17 = vld [vmem:[%s2583_s5 + $0x18] sm:$0xff]  ;;  %v467_v46 = vmul.f32 %v2019_v63, %v1966_v42  ;;  %v482_v63 = vmul.f32 %v1835_v8, %v466_v44  ;;  %v2092_v5 = vrot.slane %v1915_v38, %v2030_v52 }
 0x182   :  { %v372_v25 = vsel %vm367_vm5, %v1901_v26, %v356_v3  ;;  %v2027_v48 = vsel %vm732_vm6, %v1971_v51, %v721_v10  ;;  %v230_v50 = vpop.f32.mrf.mxu1 }
 0x183   :  { %v393_v34 = vmul.f32 %v2007_v37, %v372_v25  ;;  %81 = vperm.xlu1 %1496, %v68_v49   ;;  %v2055_v25 = vld [vmem:[%s2583_s5] sm:$0xff]  ;;  %v2059_v49 = vrot.slane %v1899_v0, %v2035_v45  ;;  %v2075_v50 = vrot.slane %v1899_v0, %v2030_v52 }
 0x185   :  { %2629 = vst [vmem:[#allocation29_spill] sm:$0xff] %v2059_v49  ;;  %v409_v57 = vmul.f32 %v1719_v29, %v393_v34  ;;  %v2062_v14 = vpop.permute.xlu1 %359  ;;  %v2064_v32 = vpop.permute.xlu0 %724  ;;  %v2079_v34 = vrot.slane %v2055_v25, %v1894_v21 }
 0x186   :  { %v370_v42 = vsel %vm367_vm5, %v356_v3, %v2062_v14  ;;  %v735_v23 = vsel %vm732_vm6, %v721_v10, %v2064_v32  ;;  %v2086_v3 = vrot.slane %v2048_v17, %v1894_v21  ;;  %v483_v10 = vmul.f32 %v1835_v8, %v467_v46 }
 0x187   :  { %2630 = vst [vmem:[#allocation30_spill] sm:$0xff] %v2079_v34  ;;  %v417_v9 = vadd.f32 %v409_v57, %v1939_v61  ;;  %v394_v30 = vmul.f32 %v2040_v15, %v370_v42  ;;  %1264 = vperm.xlu1 %1496, %v1261_v62   ;;  %v612_v57 = vmul.f32 %v2059_v49, %v589_v22 }
 0x188   :  { %2631 = vst [vmem:[#allocation31_spill] sm:$0xff] %v2086_v3  ;;  %v268_v62 = vmul.f32 %v1799_v59, %v1733_v43 }
 0x189   :  { %v410_v36 = vmul.f32 %v1719_v29, %v394_v30  ;;  %v502_v6 = vpop.permute.xlu1 %501  ;;  %v490_v47 = vadd.f32 %v482_v63, %v417_v9  ;;  %v289_v7 = vpop.permute.xlu0 %288  ;;  %v628_v43 = vmul.f32 %v1851_v12, %v612_v57 }
 0x18a   :  { %v518_v61 = vsel %vm513_vm7, %v1932_v55, %v502_v6  ;;  %v295_v21 = vsel %vm294_vm2, %v1934_v58, %v289_v7  ;;  %v301_v30 = vsel %vm294_vm2, %v289_v7, %v1903_v27 }
 0x18b   :  { %v418_v9 = vadd.f32 %v410_v36, %v1955_v24  ;;  %v539_v63 = vmul.f32 %v2075_v50, %v518_v61  ;;  %v319_v44 = vmul.f32 %v2079_v34, %v301_v30  ;;  %v322_v22 = vmul.f32 %v2086_v3, %v295_v21 }
 0x18c   :  { %v2132_v30 = vsub.s32 6, %v1688_v4 }
 0x18d   :  { %v555_v46 = vmul.f32 %v1723_v31, %v539_v63  ;;  %v335_v42 = vmul.f32 %v1881_v18, %v319_v44  ;;  %v2113_v58 = vmul.f32 %v1881_v18, %v322_v22  ;;  %v2115_v49 = vpop.permute.xlu1 %505  ;;  %v491_v7 = vadd.f32 %v483_v10, %v418_v9  ;;  %v2117_v27 = vpop.permute.xlu0 %353 }
 0x18e   :  { %v516_v24 = vsel %vm513_vm7, %v502_v6, %v2115_v49  ;;  %v2128_v18 = vsub.s32 7, %v1688_v4 }
 0x18f   :  { %v563_v36 = vadd.f32 %v555_v46, %v490_v47  ;;  %v2124_v61 = vadd.f32 %v335_v42, %v268_v62  ;;  %v540_v21 = vmul.f32 %v2092_v5, %v516_v24  ;;  %v2151_v62 = vrot.slane %v1899_v0, %v2132_v30 }
 0x190   :  { %v2147_v4 = vrot.slane %v1899_v0, %v2128_v18 }
 0x191   :  { %v556_v10 = vmul.f32 %v1723_v31, %v540_v21  ;;  %v648_v9 = vpop.permute.xlu1 %647  ;;  %v437_v63 = vpop.permute.xlu0 %436  ;;  %v636_v6 = vadd.f32 %v628_v43, %v563_v36 }
 0x192   :  { %v2137_v57 = vsel %vm659_vm8, %v1959_v39, %v648_v9  ;;  %v441_v47 = vsel %vm440_vm3, %v1961_v40, %v437_v63  ;;  %v447_v44 = vsel %vm440_vm3, %v437_v63, %v1917_v41  ;;  %2632 = vst [vmem:[#allocation32_spill] sm:$0xff] %v2147_v4  ;;  %v758_v24 = vmul.f32 %v2147_v4, %v735_v23 }
 0x193   :  { %v564_v22 = vadd.f32 %v556_v10, %v491_v7  ;;  %v2165_v7 = vrot.slane %v1915_v38, %v2035_v45 }
 0x195   :  { %v2153_v46 = vpop.permute.xlu1 %651  ;;  %v2155_v42 = vpop.permute.xlu0 %499  ;;  %2633 = vst [vmem:[#allocation33_spill] sm:$0xff] %v2165_v7 }
 0x196   :  { %v662_v40 = vsel %vm659_vm8, %v648_v9, %v2153_v46  ;;  %v774_v9 = vmul.f32 %v1869_v16, %v758_v24 }
 0x197   :  { %v685_v41 = vmul.f32 %v2151_v62, %v662_v40 }
 0x199   :  { %v701_v0 = vmul.f32 %v1727_v33, %v685_v41  ;;  %v794_v43 = vpop.permute.xlu1 %793  ;;  %v583_v36 = vpop.permute.xlu0 %582  ;;  %v2184_v41 = vld [vmem:[%s2583_s5 + $0x28] ss:$0 sm:$0xff] }
 0x19a   :  { %v2171_v21 = vsel %vm805_vm9, %v1989_v11, %v794_v43  ;;  %v587_v23 = vsel %vm586_vm4, %v1991_v13, %v583_v36  ;;  %v593_v10 = vsel %vm586_vm4, %v583_v36, %v1948_v20 }
 0x19b   :  { %v709_v63 = vadd.f32 %v701_v0, %v636_v6  ;;  %v613_v40 = vmul.f32 %v2165_v7, %v587_v23 }
 0x19d   :  { %v629_v3 = vmul.f32 %v1851_v12, %v613_v40  ;;  %v2187_v34 = vpop.permute.xlu1 %797  ;;  %v782_v4 = vadd.f32 %v774_v9, %v709_v63  ;;  %v2189_v13 = vpop.permute.xlu0 %645  ;;  %v2202_v40 = vrot.slane %v2055_v25, %v1979_v54  ;;  %v2220_v63 = vrot.slane %v2055_v25, %v1984_v60 }
 0x19e   :  { %v808_v20 = vsel %vm805_vm9, %v794_v43, %v2187_v34 }
 0x19f   :  { %v2194_v24 = vadd.f32 %v629_v3, %v564_v22  ;;  %v831_v6 = vmul.f32 %v2184_v41, %v808_v20  ;;  %v2214_v22 = vrot.slane %v2048_v17, %v1979_v54  ;;  %v2224_v20 = vrot.slane %v2048_v17, %v1984_v60 }
 0x1a1   :  { %v847_v0 = vmul.f32 %v1731_v35, %v831_v6  ;;  %v2198_v36 = vpop.permute.xlu1 %278  ;;  %v729_v23 = vpop.permute.xlu0 %728  ;;  %2634 = vst [vmem:[#allocation34_spill] sm:$0xff] %v2214_v22 }
 0x1a2   :  { %v733_v9 = vsel %vm732_vm6, %v2064_v32, %v729_v23  ;;  %v2210_v3 = vsel %vm732_vm6, %v729_v23, %v1971_v51  ;;  %v271_v51 = vmul.f32 %v1799_v59, %v1775_v56  ;;  %v468_v23 = vmul.f32 %v2214_v22, %v441_v47 }
 0x1a3   :  { %v2216_v43 = vadd.f32 %v847_v0, %v782_v4  ;;  %v465_v0 = vmul.f32 %v2202_v40, %v447_v44  ;;  %v2253_v47 = vrot.slane %v2048_v17, %v2035_v45  ;;  %v2257_v44 = vrot.slane %v2055_v25, %v2030_v52 }
 0x1a4   :  { %v346_v7 = vadd.f32 %v2113_v58, %v271_v51  ;;  %v2261_v58 = vrot.slane %v2048_v17, %v2030_v52  ;;  %v2274_v52 = vrot.slane %v2055_v25, %v2128_v18 }
 0x1a5   :  { %2635 = vst [vmem:[#allocation35_spill] sm:$0xff] %v2216_v43  ;;  %v364_v32 = vpop.permute.xlu1 %363  ;;  %v2226_v6 = vpop.permute.xlu0 %791  ;;  %2637 = vst [vmem:[#allocation37_spill] sm:$0xff] %v2253_v47 }
 0x1a6   :  { %2636 = vst [vmem:[#allocation36_spill] sm:$0xff] %v2226_v6  ;;  %v368_v54 = vsel %vm367_vm5, %v2062_v14, %v364_v32  ;;  %v374_v4 = vsel %vm367_vm5, %v364_v32, %v1901_v26  ;;  %v2249_v26 = vrot.slane %v2055_v25, %v2035_v45  ;;  %2638 = vst [vmem:[#allocation38_spill] sm:$0xff] %v2274_v52 }
 0x1a7   :  { %v392_v60 = vmul.f32 %v2220_v63, %v374_v4  ;;  %v395_v43 = vmul.f32 %v2224_v20, %v368_v54  ;;  %v2268_v54 = vrot.slane %v2055_v25, %v2132_v30 }
 0x1a9   :  { %v408_v56 = vmul.f32 %v1719_v29, %v392_v60  ;;  %v411_v59 = vmul.f32 %v1719_v29, %v395_v43  ;;  %v2243_v6 = vpop.permute.xlu1 %426  ;;  %v2245_v14 = vpop.permute.xlu0 %357  ;;  %v481_v29 = vmul.f32 %v1835_v8, %v465_v0  ;;  %v484_v43 = vmul.f32 %v1835_v8, %v468_v23 }
 0x1aa   :  { %v614_v0 = vmul.f32 %v2253_v47, %v593_v10  ;;  %v684_v25 = vmul.f32 %v2268_v54, %v2137_v57  ;;  %v2302_v10 = vld [vmem:[%s2583_s5 + $0x20] ss:$0 sm:$0xff]  ;;  %v2306_v57 = vrot.slane %v2048_v17, %v2128_v18 }
 0x1ab   :  { %v416_v32 = vadd.f32 %v408_v56, %v2124_v61  ;;  %v419_v51 = vadd.f32 %v411_v59, %v346_v7  ;;  %v611_v7 = vmul.f32 %v2249_v26, %v1976_v53  ;;  %v2291_v59 = vrot.slane %v1915_v38, %v2128_v18 }
 0x1ac   :  { %v757_v53 = vmul.f32 %v2274_v52, %v2027_v48  ;;  %v830_v18 = vmul.f32 %v2302_v10, %v2171_v21 }
 0x1ad   :  { %v510_v45 = vpop.permute.xlu1 %509  ;;  %v489_v4 = vadd.f32 %v481_v29, %v416_v32  ;;  %v492_v60 = vadd.f32 %v484_v43, %v419_v51  ;;  %v2270_v22 = vpop.permute.xlu0 %361  ;;  %v2312_v32 = vrot.slane %v1915_v38, %v2132_v30  ;;  %v627_v48 = vmul.f32 %v1851_v12, %v611_v7 }
 0x1ae   :  { %v514_v8 = vsel %vm513_vm7, %v2115_v49, %v510_v45  ;;  %v520_v61 = vsel %vm513_vm7, %v510_v45, %v1932_v55  ;;  %v630_v51 = vmul.f32 %v1851_v12, %v614_v0  ;;  %v773_v38 = vmul.f32 %v1869_v16, %v757_v53 }
 0x1af   :  { %v538_v23 = vmul.f32 %v2257_v44, %v520_v61  ;;  %v541_v56 = vmul.f32 %v2261_v58, %v514_v8  ;;  %v700_v61 = vmul.f32 %v1727_v33, %v684_v25  ;;  %v759_v47 = vmul.f32 %v2291_v59, %v733_v9 }
 0x1b0   :  { %v846_v9 = vmul.f32 %v1731_v35, %v830_v18 }
 0x1b1   :  { %v554_v49 = vmul.f32 %v1723_v31, %v538_v23  ;;  %v557_v55 = vmul.f32 %v1723_v31, %v541_v56  ;;  %v2295_v29 = vpop.permute.xlu1 %572  ;;  %v2308_v43 = vpop.permute.xlu0 %503  ;;  %v2316_v31 = vrot.slane %v2048_v17, %v2132_v30  ;;  %v760_v30 = vmul.f32 %v2306_v57, %v2210_v3 }
 0x1b3   :  { %v562_v45 = vadd.f32 %v554_v49, %v489_v4  ;;  %v565_v8 = vadd.f32 %v557_v55, %v492_v60  ;;  %v776_v3 = vmul.f32 %v1869_v16, %v760_v30 }
 0x1b5   :  { %v635_v23 = vadd.f32 %v627_v48, %v562_v45  ;;  %v656_v56 = vpop.permute.xlu1 %655  ;;  %v638_v52 = vadd.f32 %v630_v51, %v565_v8  ;;  %v2335_v7 = vpop.permute.xlu0 %507  ;;  %v2350_v51 = vld [vmem:[%s2583_s5 + $0x30] ss:$0 sm:$0xff] }
 0x1b6   :  { %v660_v17 = vsel %vm659_vm8, %v2153_v46, %v656_v56  ;;  %v666_v12 = vsel %vm659_vm8, %v656_v56, %v1959_v39  ;;  %v775_v39 = vmul.f32 %v1869_v16, %v759_v47 }
 0x1b7   :  { %v708_v4 = vadd.f32 %v700_v61, %v635_v23  ;;  %v686_v21 = vmul.f32 %v2312_v32, %v660_v17  ;;  %v687_v60 = vmul.f32 %v2316_v31, %v666_v12  ;;  %v373_v23 = vsel %vm367_vm5, %v2117_v27, %v2245_v14 }
 0x1b9   :  { %v702_v0 = vmul.f32 %v1727_v33, %v686_v21  ;;  %v703_v46 = vmul.f32 %v1727_v33, %v687_v60  ;;  %v2340_v25 = vpop.permute.xlu1 %718  ;;  %v781_v49 = vadd.f32 %v773_v38, %v708_v4  ;;  %v2355_v33 = vld [vmem:[%s2583_s5 + $0x38] ss:$0 sm:$0xff]  ;;  %v650_v61 = vpop.permute.xlu0 %649  ;;  %v371_v21 = vsel %vm367_vm5, %v2245_v14, %v2270_v22 }
 0x1bb   :  { %v710_v55 = vadd.f32 %v702_v0, %v2194_v24  ;;  %v711_v53 = vadd.f32 %v703_v46, %v638_v52  ;;  %v2345_v48 = vadd.f32 %v846_v9, %v781_v49  ;;  %v2639_v9 = vld [vmem:[#allocation15_spill] sm:$0xff]  ;;  %v2640_v49 = vld [vmem:[#allocation17_spill] sm:$0xff] }
 0x1bd   :  { %v802_v45 = vpop.permute.xlu1 %801  ;;  %v783_v8 = vadd.f32 %v775_v39, %v710_v55  ;;  %v784_v47 = vadd.f32 %v776_v3, %v711_v53  ;;  %v2384_v60 = vpop.permute.xlu0 %653  ;;  %v398_v39 = vmul.f32 %v2040_v15, %v371_v21  ;;  %v2641_v55 = vld [vmem:[#allocation22_spill] sm:$0xff]  ;;  %v2642_v53 = vld [vmem:[#allocation16_spill] sm:$0xff] }
 0x1be   :  { %v806_v16 = vsel %vm805_vm9, %v2187_v34, %v802_v45  ;;  %v812_v24 = vsel %vm805_vm9, %v802_v45, %v1989_v11  ;;  %v397_v11 = vmul.f32 %v2007_v37, %v373_v23  ;;  %v274_v45 = vmul.f32 %v1809_v1, %v2642_v53 }
 0x1bf   :  { %v832_v52 = vmul.f32 %v2350_v51, %v806_v16  ;;  %v833_v18 = vmul.f32 %v2355_v33, %v812_v24 }
 0x1c1   :  { %v848_v56 = vmul.f32 %v1731_v35, %v832_v52  ;;  %v849_v38 = vmul.f32 %v1731_v35, %v833_v18  ;;  %v283_v17 = vpop.permute.xlu1 %282  ;;  %v273_v35 = vmul.f32 %v1809_v1, %v1815_v2  ;;  %v519_v2 = vsel %vm513_vm7, %v2155_v42, %v2308_v43  ;;  %v796_v24 = vpop.permute.xlu0 %795 }
 0x1c2   :  { %v300_v34 = vsel %vm294_vm2, %v2198_v36, %v283_v17  ;;  %v414_v52 = vmul.f32 %v2640_v49, %v398_v39  ;;  %v543_v18 = vmul.f32 %v2075_v50, %v519_v2  ;;  %v2646_v39 = vld [vmem:[#allocation28_spill] sm:$0xff] }
 0x1c3   :  { %v2375_v12 = vadd.f32 %v848_v56, %v783_v8  ;;  %v2377_v30 = vadd.f32 %v849_v38, %v784_v47  ;;  %v324_v4 = vmul.f32 %v1910_v28, %v300_v34  ;;  %v413_v28 = vmul.f32 %v2640_v49, %v397_v11  ;;  %v2643_v56 = vld [vmem:[#allocation25_spill] sm:$0xff]  ;;  %v2644_v34 = vld [vmem:[#allocation11_spill] sm:$0xff] }
 0x1c5   :  { %v340_v0 = vmul.f32 %v2639_v9, %v324_v4  ;;  %v2389_v46 = vpop.permute.xlu1 %286 }
 0x1c6   :  { %v298_v37 = vsel %vm294_vm2, %v283_v17, %v2389_v46  ;;  %v517_v17 = vsel %vm513_vm7, %v2308_v43, %v2335_v7 }
 0x1c7   :  { %v348_v3 = vadd.f32 %v340_v0, %v273_v35  ;;  %v325_v14 = vmul.f32 %v2641_v55, %v298_v37  ;;  %v2645_v0 = vld [vmem:[#allocation18_spill] sm:$0xff]  ;;  %v544_v50 = vmul.f32 %v2092_v5, %v517_v17  ;;  %v2423_v55 = vpop.permute.xlu0 %799 }
 0x1c8   :  { %v559_v37 = vmul.f32 %v2645_v0, %v543_v18  ;;  %v2647_v18 = vld [vmem:[#allocation29_spill] sm:$0xff] }
 0x1c9   :  { %v341_v8 = vmul.f32 %v2639_v9, %v325_v14  ;;  %v431_v47 = vpop.permute.xlu1 %430  ;;  %v421_v16 = vadd.f32 %v413_v28, %v348_v3  ;;  %v560_v53 = vmul.f32 %v2645_v0, %v544_v50  ;;  %v809_v50 = vsel %vm805_vm9, %v796_v24, %v2423_v55 }
 0x1ca   :  { %v446_v15 = vsel %vm440_vm3, %v2243_v6, %v431_v47 }
 0x1cb   :  { %v349_v23 = vadd.f32 %v341_v8, %v274_v45  ;;  %v470_v38 = vmul.f32 %v2643_v56, %v446_v15  ;;  %v663_v8 = vsel %vm659_vm8, %v650_v61, %v2384_v60  ;;  %v366_v5 = vpop.permute.xlu0 %365  ;;  %v2648_v56 = vld [vmem:[#allocation12_spill] sm:$0xff] }
 0x1cd   :  { %v486_v11 = vmul.f32 %v2644_v34, %v470_v38  ;;  %v2415_v4 = vpop.permute.xlu1 %434  ;;  %v422_v21 = vadd.f32 %v414_v52, %v349_v23  ;;  %v689_v52 = vmul.f32 %v2151_v62, %v663_v8  ;;  %v375_v62 = vsel %vm367_vm5, %v366_v5, %v2117_v27  ;;  %v2651_v27 = vld [vmem:[#allocation14_spill] sm:$0xff] }
 0x1ce   :  { %v444_v35 = vsel %vm440_vm3, %v431_v47, %v2415_v4 }
 0x1cf   :  { %v494_v28 = vadd.f32 %v486_v11, %v421_v16  ;;  %v471_v3 = vmul.f32 %v2646_v39, %v444_v35  ;;  %v665_v11 = vsel %vm659_vm8, %v2189_v13, %v650_v61 }
 0x1d0   :  { %v688_v39 = vmul.f32 %v2268_v54, %v665_v11 }
 0x1d1   :  { %v487_v43 = vmul.f32 %v2644_v34, %v471_v3  ;;  %v577_v14 = vpop.permute.xlu1 %576  ;;  %v567_v2 = vadd.f32 %v559_v37, %v494_v28  ;;  %v512_v28 = vpop.permute.xlu0 %511 }
 0x1d2   :  { %v521_v54 = vsel %vm513_vm7, %v512_v28, %v2155_v42  ;;  %v515_v42 = vsel %vm513_vm7, %v2335_v7, %v512_v28  ;;  %v2656_v7 = vld [vmem:[#allocation30_spill] sm:$0xff] }
 0x1d3   :  { %v495_v45 = vadd.f32 %v487_v43, %v422_v21  ;;  %v2649_v21 = vld [vmem:[#allocation19_spill] sm:$0xff] }
 0x1d4   :  { %v705_v35 = vmul.f32 %v2649_v21, %v689_v52  ;;  %v2652_v52 = vld [vmem:[#allocation20_spill] sm:$0xff] }
 0x1d5   :  { %v2430_v47 = vpop.permute.xlu1 %580  ;;  %v2432_v15 = vadd.f32 %v560_v53, %v495_v45  ;;  %v369_v53 = vsel %vm367_vm5, %v2270_v22, %v366_v5  ;;  %v2650_v45 = vld [vmem:[#allocation32_spill] sm:$0xff]  ;;  %v2654_v5 = vld [vmem:[#allocation13_spill] sm:$0xff] }
 0x1d6   :  { %v590_v16 = vsel %vm586_vm4, %v577_v14, %v2430_v47 }
 0x1d7   :  { %v616_v23 = vmul.f32 %v2647_v18, %v590_v16  ;;  %v272_v16 = vmul.f32 %v1809_v1, %v2651_v27  ;;  %v275_v18 = vmul.f32 %v1809_v1, %v2652_v52  ;;  %v542_v1 = vmul.f32 %v2257_v44, %v521_v54 }
 0x1d9   :  { %v632_v38 = vmul.f32 %v2648_v56, %v616_v23  ;;  %v723_v17 = vpop.permute.xlu1 %722  ;;  %v396_v23 = vmul.f32 %v2220_v63, %v375_v62  ;;  %v558_v52 = vmul.f32 %v2645_v0, %v542_v1 }
 0x1db   :  { %v640_v37 = vadd.f32 %v632_v38, %v567_v2  ;;  %v835_v2 = vmul.f32 %v2184_v41, %v809_v50  ;;  %v2470_v41 = vmul.f32 %v2649_v21, %v688_v39  ;;  %v2653_v38 = vld [vmem:[#allocation36_spill] sm:$0xff]  ;;  %v658_v50 = vpop.permute.xlu0 %657  ;;  %v2655_v39 = vld [vmem:[#allocation21_spill] sm:$0xff]  ;;  %v412_v44 = vmul.f32 %v2640_v49, %v396_v23 }
 0x1dc   :  { %v811_v22 = vsel %vm805_vm9, %v2653_v38, %v796_v24 }
 0x1dd   :  { %v2451_v3 = vpop.permute.xlu1 %726  ;;  %v713_v43 = vadd.f32 %v705_v35, %v640_v37  ;;  %v399_v37 = vmul.f32 %v2224_v20, %v369_v53  ;;  %v851_v62 = vmul.f32 %v2655_v39, %v835_v2  ;;  %v834_v20 = vmul.f32 %v2302_v10, %v811_v22 }
 0x1de   :  { %v736_v61 = vsel %vm732_vm6, %v723_v17, %v2451_v3  ;;  %v545_v53 = vmul.f32 %v2261_v58, %v515_v42 }
 0x1df   :  { %v762_v8 = vmul.f32 %v2650_v45, %v736_v61  ;;  %v2657_v45 = vld [vmem:[#allocation31_spill] sm:$0xff]  ;;  %v415_v10 = vmul.f32 %v2640_v49, %v399_v37 }
 0x1e0   :  { %v561_v49 = vmul.f32 %v2645_v0, %v545_v53 }
 0x1e1   :  { %v778_v11 = vmul.f32 %v2654_v5, %v762_v8  ;;  %v291_v35 = vpop.permute.xlu1 %290 }
 0x1e2   :  { %v296_v63 = vsel %vm294_vm2, %v2389_v46, %v291_v35  ;;  %v302_v24 = vsel %vm294_vm2, %v291_v35, %v2198_v36  ;;  %v592_v46 = vsel %vm586_vm4, %v2295_v29, %v577_v14  ;;  %v661_v36 = vsel %vm659_vm8, %v2384_v60, %v658_v50  ;;  %v804_v35 = vpop.permute.xlu0 %803 }
 0x1e3   :  { %v786_v61 = vadd.f32 %v778_v11, %v713_v43  ;;  %v323_v28 = vmul.f32 %v2656_v7, %v302_v24  ;;  %v326_v8 = vmul.f32 %v2657_v45, %v296_v63  ;;  %v667_v60 = vsel %vm659_vm8, %v658_v50, %v2189_v13  ;;  %v2659_v50 = vld [vmem:[#allocation33_spill] sm:$0xff]  ;;  %v2661_v7 = vld [vmem:[#allocation38_spill] sm:$0xff] }
 0x1e4   :  { %v615_v42 = vmul.f32 %v2249_v26, %v592_v46  ;;  %v690_v11 = vmul.f32 %v2312_v32, %v661_v36 }
 0x1e5   :  { %v339_v43 = vmul.f32 %v2639_v9, %v323_v28  ;;  %v342_v2 = vmul.f32 %v2639_v9, %v326_v8  ;;  %v2501_v54 = vadd.f32 %v851_v62, %v786_v61  ;;  %v439_v27 = vpop.permute.xlu1 %438  ;;  %v2660_v62 = vld [vmem:[#allocation37_spill] sm:$0xff] }
 0x1e6   :  { %v442_v58 = vsel %vm440_vm3, %v2415_v4, %v439_v27  ;;  %v448_v14 = vsel %vm440_vm3, %v439_v27, %v2243_v6  ;;  %v2658_v4 = vld [vmem:[#allocation34_spill] sm:$0xff]  ;;  %v738_v6 = vsel %vm732_vm6, %v2340_v25, %v723_v17  ;;  %v807_v17 = vsel %vm805_vm9, %v2423_v55, %v804_v35 }
 0x1e7   :  { %v347_v9 = vadd.f32 %v339_v43, %v272_v16  ;;  %v350_v23 = vadd.f32 %v342_v2, %v275_v18  ;;  %v469_v22 = vmul.f32 %v2202_v40, %v448_v14  ;;  %v472_v37 = vmul.f32 %v2658_v4, %v442_v58 }
 0x1e8   :  { %v691_v40 = vmul.f32 %v2316_v31, %v667_v60  ;;  %v631_v31 = vmul.f32 %v2648_v56, %v615_v42  ;;  %v761_v28 = vmul.f32 %v2661_v7, %v738_v6  ;;  %v836_v53 = vmul.f32 %v2350_v51, %v807_v17 }
 0x1e9   :  { %v420_v1 = vadd.f32 %v412_v44, %v347_v9  ;;  %v423_v63 = vadd.f32 %v415_v10, %v350_v23  ;;  %v485_v13 = vmul.f32 %v2644_v34, %v469_v22  ;;  %v585_v16 = vpop.permute.xlu1 %584  ;;  %v488_v0 = vmul.f32 %v2644_v34, %v472_v37  ;;  %v872_v23 = vpop.permute.xlu0 %871 }
 0x1ea   :  { %v588_v26 = vsel %vm586_vm4, %v2430_v47, %v585_v16  ;;  %v594_v32 = vsel %vm586_vm4, %v585_v16, %v2295_v29  ;;  %v706_v34 = vmul.f32 %v2649_v21, %v690_v11  ;;  %v813_v29 = vsel %vm805_vm9, %v804_v35, %v2653_v38 }
 0x1eb   :  { %v493_v18 = vadd.f32 %v485_v13, %v420_v1  ;;  %v617_v24 = vmul.f32 %v2659_v50, %v588_v26  ;;  %v618_v61 = vmul.f32 %v2660_v62, %v594_v32  ;;  %v496_v47 = vadd.f32 %v488_v0, %v423_v63  ;;  %v2662_v13 = vld [vmem:[#allocation35_spill] sm:$0xff] }
 0x1ec   :  { %v837_v51 = vmul.f32 %v2355_v33, %v813_v29 }
 0x1ed   :  { %v566_v45 = vadd.f32 %v558_v52, %v493_v18  ;;  %v633_v8 = vmul.f32 %v2648_v56, %v617_v24  ;;  %v634_v55 = vmul.f32 %v2648_v56, %v618_v61  ;;  %v731_v44 = vpop.permute.xlu1 %730  ;;  %v569_v46 = vadd.f32 %v561_v49, %v496_v47  ;;  %v2664_v47 = vld [vmem:[#allocation27_spill] sm:$0xff] }
 0x1ee   :  { %v734_v36 = vsel %vm732_vm6, %v2451_v3, %v731_v44  ;;  %v740_v43 = vsel %vm732_vm6, %v731_v44, %v2340_v25  ;;  %v707_v56 = vmul.f32 %v2649_v21, %v691_v40  ;;  %v777_v52 = vmul.f32 %v2654_v5, %v761_v28 }
 0x1ef   :  { %v639_v2 = vadd.f32 %v631_v31, %v566_v45  ;;  %v641_v38 = vadd.f32 %v633_v8, %v2432_v15  ;;  %v763_v27 = vmul.f32 %v2291_v59, %v734_v36  ;;  %v764_v10 = vmul.f32 %v2306_v57, %v740_v43  ;;  %v2666_v36 = vld [vmem:[#allocation24_spill] sm:$0xff] }
 0x1f0   :  { %v642_v58 = vadd.f32 %v634_v55, %v569_v46  ;;  %v850_v15 = vmul.f32 %v2655_v39, %v834_v20  ;;  %v852_v59 = vmul.f32 %v2655_v39, %v836_v53  ;;  %v853_v21 = vmul.f32 %v2655_v39, %v837_v51  ;;  %v2665_v53 = vld [vmem:[#allocation23_spill] sm:$0xff] }
 0x1f1   :  { %v712_v3 = vadd.f32 %v2470_v41, %v639_v2  ;;  %v714_v14 = vadd.f32 %v706_v34, %v641_v38  ;;  %v779_v19 = vmul.f32 %v2654_v5, %v763_v27  ;;  %v780_v25 = vmul.f32 %v2654_v5, %v764_v10 }
 0x1f2   :  { %v715_v60 = vadd.f32 %v707_v56, %v642_v58  ;;  %v879_v41 = vadd.f32 %v872_v23, %v2501_v54  ;;  %v1626_v27 = vmov 0.0  }
 0x1f3   :  { %v785_v57 = vadd.f32 %v777_v52, %v712_v3  ;;  %v787_v9 = vadd.f32 %v779_v19, %v714_v14  ;;  %1444 = vmatprep.subr.bf16.mxu0 %v1626_v27 }
 0x1f4   :  { %v788_v33 = vadd.f32 %v780_v25, %v715_v60  ;;  %v887_v5 = vmax.f32 %v879_v41, 0.0 }
 0x1f5   :  { %v860_v22 = vadd.f32 %v852_v59, %v787_v9  ;;  %v858_v49 = vadd.f32 %v850_v15, %v785_v57 }
 0x1f6   :  { %v861_v42 = vadd.f32 %v853_v21, %v788_v33  ;;  %v895_v17 = vmin.f32 %v887_v5, 6.0 }
 0x1f7   :  { %v880_v11 = vadd.f32 %v872_v23, %v860_v22  ;;  %v878_v35 = vadd.f32 %v872_v23, %v858_v49 }
 0x1f8   :  { %v881_v4 = vadd.f32 %v872_v23, %v861_v42 }
 0x1f9   :  { %v886_v6 = vmax.f32 %v878_v35, 0.0  ;;  %v888_v20 = vmax.f32 %v880_v11, 0.0 }
 0x1fa   :  { %v867_v37 = vpop.permute.xlu1 %866  ;;  %v889_v1 = vmax.f32 %v881_v4, 0.0 }
 0x1fb   :  { %v874_v63 = vadd.f32 %v867_v37, %v2345_v48  ;;  %v875_v16 = vadd.f32 %v867_v37, %v2662_v13  ;;  %v876_v39 = vadd.f32 %v867_v37, %v2375_v12  ;;  %v877_v40 = vadd.f32 %v867_v37, %v2377_v30  ;;  %v2663_v48 = vld [vmem:[#allocation26_spill] sm:$0xff] }
 0x1fc   :  { %v894_v18 = vmin.f32 %v886_v6, 6.0  ;;  %v896_v50 = vmin.f32 %v888_v20, 6.0  ;;  %v897_v62 = vmin.f32 %v889_v1, 6.0  ;;  %v1258_v1 = vld [vmem:[%s2585_s7] sm:$0xf]  ;;  %s1576_s7 = scalar_lea.vmem %s1330_s14, 128 }
 0x1fd   :  { %v882_v0 = vmax.f32 %v874_v63, 0.0  ;;  %v883_v26 = vmax.f32 %v875_v16, 0.0  ;;  %v884_v54 = vmax.f32 %v876_v39, 0.0  ;;  %v885_v32 = vmax.f32 %v877_v40, 0.0  ;;  %p1577_p10 = scmp.ne.s32.totalorder %s1330_s14, %s1576_s7  ;;  %p1582_p12 = scmp.lt.s32.totalorder %s1576_s7, %s1576_s7 }
 0x1fe   :  { %v82_v24 = vpop.permute.xlu1 %81 }
 0x1ff   :  { %v890_v61 = vmin.f32 %v882_v0, 6.0  ;;  %v892_v31 = vmin.f32 %v884_v54, 6.0  ;;  %v891_v34 = vmin.f32 %v883_v26, 6.0  ;;  %v893_v7 = vmin.f32 %v885_v32, 6.0  ;;  %p1583_p13 = por %p1582_p12, %p1581_p11 }
 0x200   :  { %v177_v28 = vadd.f32 %v2663_v48, %v82_v24  ;;  %v228_v29 = vadd.f32 %v2664_v47, %v82_v24  ;;  %v175_v46 = vadd.f32 %v2665_v53, %v82_v24  ;;  %v226_v43 = vadd.f32 %v2666_v36, %v82_v24 }
 0x201   :  { %v898_v12 = vpack.c.bf16 %v894_v18, %v890_v61  ;;  %v900_v45 = vpack.c.bf16 %v896_v50, %v892_v31  ;;  %v899_v30 = vpack.c.bf16 %v895_v17, %v891_v34  ;;  %v901_v8 = vpack.c.bf16 %v897_v62, %v893_v7  ;;  %p1584_p0 = pnand %p1583_p13, %p1577_p10 }
 0x202   :  { %v903_v55 = vpack.c.bf16 %v177_v28, %v177_v28  ;;  %v905_v44 = vpack.c.bf16 %v228_v29, %v228_v29  ;;  %v902_v2 = vpack.c.bf16 %v175_v46, %v175_v46  ;;  %v904_v38 = vpack.c.bf16 %v226_v43, %v226_v43  ;;  %v1265_v63 = vpop.permute.xlu1 %1264 }
 0x203   :  { %1194 = vmatprep.mubr.bf16.mxu0 %v899_v30  ;;  %1242 = vmatprep.mubr.bf16.mxu1 %v901_v8 }
 0x204   :  { %1195 = vmatmul.mubr.bf16.vlgmr.msra.gmra.mxu0 %v898_v12  ;;  %1243 = vmatmul.mubr.bf16.vlgmr.msra.gmra.mxu1 %v900_v45 }
 0x205   :  { %1202 = vmatprep.mubr.bf16.mxu0 %v903_v55  ;;  %1250 = vmatprep.mubr.bf16.mxu1 %v905_v44 }
 0x20c   :  { %1203 = vmatmul.mubr.bf16.gmra.mxu0 %v902_v2  ;;  %1251 = vmatmul.mubr.bf16.gmra.mxu1 %v904_v38 }
 0x20d   :  { %1448 = vmatprep.mubr.msk.bf16.mxu0 %vm1627_vm10, %v1626_v27 }
 0x2c4   :  { %v1401_v10 = vpop.f32.mrf.mxu0  ;;  %v1429_v56 = vpop.f32.mrf.mxu1 }
 0x2c6   :  { %v1402_v51 = vpop.f32.mrf.mxu0  ;;  %v1430_v52 = vpop.f32.mrf.mxu1 }
 0x2c7   :  { %v1403_v41 = vadd.f32 %v1402_v51, %v1401_v10  ;;  %v1431_v42 = vadd.f32 %v1430_v52, %v1429_v56 }
 0x2c8   :  { %v1404_v58 = vpop.f32.mrf.mxu0  ;;  %v1432_v3 = vpop.f32.mrf.mxu1 }
 0x2c9   :  { %v1245_v6 = vadd.f32 %v1431_v42, %v1403_v41 }
 0x2ca   :  { %v1405_v14 = vpop.f32.mrf.mxu0  ;;  %v1433_v19 = vpop.f32.mrf.mxu1 }
 0x2cb   :  { %v1406_v21 = vadd.f32 %v1405_v14, %v1404_v58  ;;  %v1434_v33 = vadd.f32 %v1433_v19, %v1432_v3 }
 0x2cc   :  { %v1407_v25 = vpop.f32.mrf.mxu0  ;;  %v1435_v60 = vpop.f32.mrf.mxu1 }
 0x2cd   :  { %v1248_v5 = vadd.f32 %v1434_v33, %v1406_v21 }
 0x2ce   :  { %v1408_v15 = vpop.f32.mrf.mxu0  ;;  %v1436_v59 = vpop.f32.mrf.mxu1 }
 0x2cf   :  { %v1409_v57 = vadd.f32 %v1408_v15, %v1407_v25  ;;  %v1437_v9 = vadd.f32 %v1436_v59, %v1435_v60  ;;  %v1259_v20 = vpack.c.bf16 %v1248_v5, %v1245_v6 }
 0x2d0   :  { %v1410_v23 = vpop.f32.mrf.mxu0  ;;  %v1438_v22 = vpop.f32.mrf.mxu1 }
 0x2d1   :  { %v1253_v49 = vadd.f32 %v1437_v9, %v1409_v57 }
 0x2d2   :  { %v1411_v11 = vpop.f32.mrf.mxu0  ;;  %v1439_v35 = vpop.f32.mrf.mxu1 }
 0x2d3   :  { %v1260_v4 = vpack.c.bf16 %v1253_v49, %v1253_v49 }
 0x2d5   :  { %v1273_v37 = vsel %vm1271_vm11, %v1260_v4, 0 }
 0x2d6   :  { %1445 = vmatpush3.bf16.msra.mxu0 %v1273_v37 }
 0x2d7   :  { %1446 = vmatprep.subr.bf16.mxu0 %v1626_v27 }
 0x2da   :  { %1447 = vmatpush3.bf16.msra.mxu0 %v1259_v20 }
 0x2dd   :  { %1449 = vmatmul.mubr.msk.bf16.vlgmr.msra.gmra.mxu0 %vm1267_vm12, %v1258_v1 }
 0x39d   :  { %v1309_v13 = vpop.f32.mrf.mxu0 }
 0x39e   :  { %v1310_v16 = vadd.f32 %v1309_v13, %v1265_v63 }
 0x39f   :  { %v1450_v39 = vpop.f32.mrf.mxu0 }
 0x3a0   :  { %v1384_v40 = vmul.f32 -1.442695, %v1310_v16 }
 0x3a1   :  { %v1312_v0 = vpop.f32.mrf.mxu0 }
 0x3a2   :  { %1532 = vpow2.f32 %v1384_v40 }
 0x3a3   :  { %v1451_v26 = vpop.f32.mrf.mxu0 }
 0x3af   :  { %v1533_v54 = vpop.eup %1532 }
 0x3b0   :  { %v1318_v32 = vadd.f32 1.0, %v1533_v54 }
 0x3b2   :  { %1534 = vrcp.f32 %v1318_v32 }
 0x3bf   :  { %v1535_v17 = vpop.eup %1534 }
 0x3c0   :  { %v1321_v18 = vmul.f32 %v1535_v17, %v1310_v16 }
 0x3c2   :  { %1322 = vst [vmem:[#allocation7] sm:$0xff] %v1321_v18 }
 0x3c3   :  { %1587 = shalt.err (!%p1584_p0)
}
 0x3c4   :  { %1332 = dma.vmem_to_hbm [thread:$0]  %s1330_s14, 128, %s2587_s9, [#allocation4]  }
 0x3c5   :  { %1600 = dma.done.wait [#allocation4], 128  }
 0x3c6   :  { %1601 = vsyncadd [#allocation4], 4294967168 }
 0x3c7   :  { %1336 = vsyncpa [#allocation3], 1 }
 0x3c8   :  { %1337 = vsyncpa [#allocation6], 1 }
 0x3c9   :  { %1338 = vsyncpa [#allocation4], 1 }

</bundles_post_ra>
